<compile_context>
chip_gen: v7x
topology: tpu7x:2x2x1
jax: 0.10.0
libtpu: 0.0.40
codegen_flags: <defaults>
</compile_context>

<pallas_src>
import functools

import jax
import jax.numpy as jnp
from jax.experimental import pallas as pl
from jax.experimental.pallas import tpu as pltpu


def _linear_ae_kernel(
    out_dims,                                   # static: per-layer output widths
    x_ref,
    ball_ref,                                   # packed biases (8, max_out) f32
    we1, we2, we3, we4,                         # encoder weights (in, out)
    wd1, wd2, wd3, wd4,                         # decoder weights (in, out)
    xrec_ref, z_ref,
):
    f32 = jnp.float32

    def bias(i):
        # (1, out_dims[i]) slice of the packed bias slab (static offsets).
        return ball_ref[i:i + 1, :out_dims[i]].astype(f32)

    def dense(h, w_ref, b):
        # Cast activations to the weight dtype (bf16) so the MXU consumes
        # native bf16 operands; accumulate in f32.
        w = w_ref[...]
        return jnp.dot(h.astype(w.dtype), w, preferred_element_type=f32) + b

    h = x_ref[...].astype(f32)

    # ---- encoder ----
    h = jnp.maximum(dense(h, we1, bias(0)), 0.0)
    h = jnp.maximum(dense(h, we2, bias(1)), 0.0)
    h = jnp.maximum(dense(h, we3, bias(2)), 0.0)
    z = dense(h, we4, bias(3))                  # latent, no activation
    z_ref[...] = z.astype(z_ref.dtype)          # note: last dim 3 -> masked store, negligible

    # ---- decoder ----
    # First decoder layer: contraction dim = latent (default 3). A full MXU
    # pass would be almost empty, so do it as a VPU broadcast-MAC (full f32).
    wd1f = wd1[...].astype(f32)                 # (latent, hid3)
    acc = jnp.zeros((z.shape[0], wd1f.shape[1]), f32)
    for k in range(wd1f.shape[0]):              # static unroll, latent is tiny
        acc = acc + z[:, k:k + 1] * wd1f[k:k + 1, :]
    h = jnp.maximum(acc + bias(4), 0.0)

    h = jnp.maximum(dense(h, wd2, bias(5)), 0.0)
    h = jnp.maximum(dense(h, wd3, bias(6)), 0.0)
    y = dense(h, wd4, bias(7))
    xrec_ref[...] = jax.nn.sigmoid(y).astype(xrec_ref.dtype)


def linear_autoencoder_forward(x, params, *, batch_tile=512):
    """x: [B, input_dim]. params: dict of pre-transposed (in,out) weights
    (bf16 or f32) and (1,out) f32 biases. Returns (x_recon [B,input_dim],
    z [B,latent])."""
    B, D = x.shape
    latent = params["we4"].shape[1]

    w_names = ("we1", "we2", "we3", "we4", "wd1", "wd2", "wd3", "wd4")
    b_names = ("be1", "be2", "be3", "be4", "bd1", "bd2", "bd3", "bd4")
    w_args = [params[k] for k in w_names]
    out_dims = tuple(int(w.shape[1]) for w in w_args)
    max_out = max(out_dims)

    # Pack all 8 biases into one lane-dense f32 slab -> a single grid-invariant DMA.
    ball = jnp.stack([
        jnp.pad(params[n].reshape(-1).astype(jnp.float32),
                (0, max_out - params[n].size))
        for n in b_names])

    # ---- batch tile selection ----
    itemsize = jnp.dtype(x.dtype).itemsize
    if B <= 8:
        tb = B                                   # tiny batch: single full block
    else:
        tb = min(batch_tile, B)
        tb = max(8, (tb // 8) * 8)               # sublane multiple
        # v7x has 2 TensorCores: prefer >= 2 parallel grid steps when batch allows.
        if (B + tb - 1) // tb < 2 and B >= 16:
            tb = max(8, ((B // 2) // 8) * 8)
        # Cap double-buffered x / x_recon / z tiles to a conservative VMEM
        # budget so the tile is safe on v7x (64 MiB physical, 32 MiB scoped default).
        budget = 16 * 1024 * 1024
        def tile_bytes(t):
            return 2 * 2 * t * D * itemsize + 2 * 2 * t * latent * itemsize
        while tb > 8 and tile_bytes(tb) > budget:
            tb = max(8, ((tb // 2) // 8) * 8)

    B_pad = ((B + tb - 1) // tb) * tb
    xp = x if B_pad == B else jnp.pad(x, ((0, B_pad - B), (0, 0)))
    grid = (B_pad // tb,)

    x_spec = pl.BlockSpec((tb, D), lambda i: (i, 0))

    def full(a):
        # Grid-invariant block (whole array); Pallas DMAs it once since the
        # block index never changes across the grid.
        return pl.BlockSpec(a.shape, lambda i: (0,) * a.ndim)

    in_specs = [x_spec, full(ball)] + [full(w) for w in w_args]

    out_shape = (
        jax.ShapeDtypeStruct((B_pad, D), x.dtype),       # x_recon
        jax.ShapeDtypeStruct((B_pad, latent), x.dtype),  # z
    )
    out_specs = (
        pl.BlockSpec((tb, D), lambda i: (i, 0)),
        pl.BlockSpec((tb, latent), lambda i: (i, 0)),
    )

    kernel = functools.partial(_linear_ae_kernel, out_dims)

    x_recon, z = pl.pallas_call(
        kernel,
        out_shape=out_shape,
        grid_spec=pltpu.PrefetchScalarGridSpec(
            num_scalar_prefetch=0,
            grid=grid,
            in_specs=in_specs,
            out_specs=out_specs,
        ),
        compiler_params=pltpu.CompilerParams(
            dimension_semantics=("parallel",)),
    )(xp, ball, *w_args)

    if B_pad != B:
        x_recon, z = x_recon[:B], z[:B]
    return x_recon, z


def init_params(key, input_dim, hid1=128, hid2=64, hid3=16, hid4=3,
                weight_dtype=jnp.bfloat16):
    """PyTorch-style init U(-1/sqrt(fan_in), 1/sqrt(fan_in)).
    Weights stored pre-transposed as (in, out) in `weight_dtype` (bf16 for the
    MXU); biases as (1, out) float32."""
    dims = [
        ("we1", "be1", input_dim, hid1),
        ("we2", "be2", hid1, hid2),
        ("we3", "be3", hid2, hid3),
        ("we4", "be4", hid3, hid4),
        ("wd1", "bd1", hid4, hid3),
        ("wd2", "bd2", hid3, hid2),
        ("wd3", "bd3", hid2, hid1),
        ("wd4", "bd4", hid1, input_dim),
    ]
    params = {}
    for (wname, bname, fan_in, fan_out) in dims:
        key, kw, kb = jax.random.split(key, 3)
        bound = 1.0 / (fan_in ** 0.5)
        w = jax.random.uniform(kw, (fan_in, fan_out), jnp.float32,
                               minval=-bound, maxval=bound)
        b = jax.random.uniform(kb, (1, fan_out), jnp.float32,
                               minval=-bound, maxval=bound)
        params[wname] = w.astype(weight_dtype)
        params[bname] = b
    return params


def _reference_forward(x, params):
    """Pure-JAX reference mirroring the kernel's numerics (bf16 operands on the
    matmuls, f32 accumulation; full-f32 VPU MAC on the first decoder layer)."""
    f32 = jnp.float32

    def dense(h, w, b):
        return (jnp.dot(h.astype(w.dtype).astype(f32), w.astype(f32)) +
                b.reshape(1, -1).astype(f32))

    h = x.astype(f32)
    h = jax.nn.relu(dense(h, params["we1"], params["be1"]))
    h = jax.nn.relu(dense(h, params["we2"], params["be2"]))
    h = jax.nn.relu(dense(h, params["we3"], params["be3"]))
    z = dense(h, params["we4"], params["be4"])

    wd1f = params["wd1"].astype(f32)
    acc = jnp.zeros((z.shape[0], wd1f.shape[1]), f32)
    for k in range(wd1f.shape[0]):
        acc = acc + z[:, k:k + 1] * wd1f[k:k + 1, :]
    h = jax.nn.relu(acc + params["bd1"].reshape(1, -1).astype(f32))

    h = jax.nn.relu(dense(h, params["wd2"], params["bd2"]))
    h = jax.nn.relu(dense(h, params["wd3"], params["bd3"]))
    y = dense(h, params["wd4"], params["bd4"])
    return jax.nn.sigmoid(y), z


if __name__ == "__main__":
    key = jax.random.PRNGKey(0)
    kx, kp = jax.random.split(key)

    batch = 256
    input_dim = 256  # e.g. a flattened 16x16 single-channel image

    x = jax.random.uniform(kx, (batch, input_dim), jnp.float32)  # img-like in [0,1)
    params = init_params(kp, input_dim)

    # batch_tile=128 -> 2 parallel grid steps (exercises the v7x dual-TC path).
    x_recon, z = linear_autoencoder_forward(x, params, batch_tile=128)
    jax.block_until_ready((x_recon, z))

    # sanity check against a pure-JAX reference with matching numerics
    xr_ref, z_ref = _reference_forward(x, params)
    assert x_recon.shape == (batch, input_dim) and z.shape == (batch, 3)
    assert jnp.allclose(x_recon, xr_ref, atol=1e-3, rtol=1e-3)
    assert jnp.allclose(z, z_ref, atol=1e-3, rtol=1e-3)

    print("KERNEL_OK")
</pallas_src>

<mosaic_0001>
module attributes {stable_mosaic.version = 11 : i64} {
  func.func @_linear_ae_kernel(%arg0: i32, %arg1: memref<128x256xf32, #tpu.memory_space<vmem>>, %arg2: memref<8x256xf32, #tpu.memory_space<vmem>>, %arg3: memref<256x128xbf16, #tpu.memory_space<vmem>>, %arg4: memref<128x64xbf16, #tpu.memory_space<vmem>>, %arg5: memref<64x16xbf16, #tpu.memory_space<vmem>>, %arg6: memref<16x3xbf16, #tpu.memory_space<vmem>>, %arg7: memref<3x16xbf16, #tpu.memory_space<vmem>>, %arg8: memref<16x64xbf16, #tpu.memory_space<vmem>>, %arg9: memref<64x128xbf16, #tpu.memory_space<vmem>>, %arg10: memref<128x256xbf16, #tpu.memory_space<vmem>>, %arg11: memref<128x256xf32, #tpu.memory_space<vmem>>, %arg12: memref<128x3xf32, #tpu.memory_space<vmem>>) attributes {dimension_semantics = [#tpu.dimension_semantics<parallel>], iteration_bounds = array<i64: 2>, scalar_prefetch = 0 : i64, scratch_operands = 0 : i64, tpu.core_type = #tpu.core_type<tc>, window_params = [{transform_indices = @transform_0, window_bounds = array<i64: 128, 256>}, {pipeline_mode = #tpu.pipeline_mode<synchronous>, transform_indices = @transform_1, window_bounds = array<i64: 8, 256>}, {pipeline_mode = #tpu.pipeline_mode<synchronous>, transform_indices = @transform_2, window_bounds = array<i64: 256, 128>}, {pipeline_mode = #tpu.pipeline_mode<synchronous>, transform_indices = @transform_3, window_bounds = array<i64: 128, 64>}, {pipeline_mode = #tpu.pipeline_mode<synchronous>, transform_indices = @transform_4, window_bounds = array<i64: 64, 16>}, {pipeline_mode = #tpu.pipeline_mode<synchronous>, transform_indices = @transform_5, window_bounds = array<i64: 16, 3>}, {pipeline_mode = #tpu.pipeline_mode<synchronous>, transform_indices = @transform_6, window_bounds = array<i64: 3, 16>}, {pipeline_mode = #tpu.pipeline_mode<synchronous>, transform_indices = @transform_7, window_bounds = array<i64: 16, 64>}, {pipeline_mode = #tpu.pipeline_mode<synchronous>, transform_indices = @transform_8, window_bounds = array<i64: 64, 128>}, {pipeline_mode = #tpu.pipeline_mode<synchronous>, transform_indices = @transform_9, window_bounds = array<i64: 128, 256>}, {transform_indices = @transform_10, window_bounds = array<i64: 128, 256>}, {transform_indices = @transform_11, window_bounds = array<i64: 128, 3>}]} {
    %c0 = arith.constant 0 : index
    %c0_0 = arith.constant 0 : index
    %0 = vector.load %arg1[%c0, %c0_0] : memref<128x256xf32, #tpu.memory_space<vmem>>, vector<128x256xf32>
    %c0_1 = arith.constant 0 : index
    %c0_2 = arith.constant 0 : index
    %1 = vector.load %arg2[%c0_1, %c0_2] : memref<8x256xf32, #tpu.memory_space<vmem>>, vector<1x128xf32>
    %c0_3 = arith.constant 0 : index
    %c0_4 = arith.constant 0 : index
    %2 = vector.load %arg3[%c0_3, %c0_4] : memref<256x128xbf16, #tpu.memory_space<vmem>>, vector<256x128xbf16>
    %3 = arith.truncf %0 : vector<128x256xf32> to vector<128x256xbf16>
    %cst = arith.constant dense<0.000000e+00> : vector<128x128xf32>
    %4 = tpu.matmul %3, %2, %cst {dimension_numbers = #tpu.dot_dimension_numbers<[1], [0], [0], [1], [0, 0, 1, 1], [], []>} : vector<128x256xbf16>, vector<256x128xbf16>, vector<128x128xf32> -> vector<128x128xf32>
    %5 = vector.broadcast %1 : vector<1x128xf32> to vector<128x128xf32>
    %6 = arith.addf %4, %5 : vector<128x128xf32>
    %cst_5 = arith.constant 0.000000e+00 : f32
    %7 = vector.broadcast %cst_5 : f32 to vector<128x128xf32>
    %8 = arith.maximumf %6, %7 : vector<128x128xf32>
    %c1 = arith.constant 1 : index
    %c0_6 = arith.constant 0 : index
    %9 = vector.load %arg2[%c1, %c0_6] : memref<8x256xf32, #tpu.memory_space<vmem>>, vector<1x64xf32>
    %c0_7 = arith.constant 0 : index
    %c0_8 = arith.constant 0 : index
    %10 = vector.load %arg4[%c0_7, %c0_8] : memref<128x64xbf16, #tpu.memory_space<vmem>>, vector<128x64xbf16>
    %11 = arith.truncf %8 : vector<128x128xf32> to vector<128x128xbf16>
    %cst_9 = arith.constant dense<0.000000e+00> : vector<128x64xf32>
    %12 = tpu.matmul %11, %10, %cst_9 {dimension_numbers = #tpu.dot_dimension_numbers<[1], [0], [0], [1], [0, 0, 1, 1], [], []>} : vector<128x128xbf16>, vector<128x64xbf16>, vector<128x64xf32> -> vector<128x64xf32>
    %13 = vector.broadcast %9 : vector<1x64xf32> to vector<128x64xf32>
    %14 = arith.addf %12, %13 : vector<128x64xf32>
    %cst_10 = arith.constant 0.000000e+00 : f32
    %15 = vector.broadcast %cst_10 : f32 to vector<128x64xf32>
    %16 = arith.maximumf %14, %15 : vector<128x64xf32>
    %c2 = arith.constant 2 : index
    %c0_11 = arith.constant 0 : index
    %17 = vector.load %arg2[%c2, %c0_11] : memref<8x256xf32, #tpu.memory_space<vmem>>, vector<1x16xf32>
    %c0_12 = arith.constant 0 : index
    %c0_13 = arith.constant 0 : index
    %18 = vector.load %arg5[%c0_12, %c0_13] : memref<64x16xbf16, #tpu.memory_space<vmem>>, vector<64x16xbf16>
    %19 = arith.truncf %16 : vector<128x64xf32> to vector<128x64xbf16>
    %cst_14 = arith.constant dense<0.000000e+00> : vector<128x16xf32>
    %20 = tpu.matmul %19, %18, %cst_14 {dimension_numbers = #tpu.dot_dimension_numbers<[1], [0], [0], [1], [0, 0, 1, 1], [], []>} : vector<128x64xbf16>, vector<64x16xbf16>, vector<128x16xf32> -> vector<128x16xf32>
    %21 = vector.broadcast %17 : vector<1x16xf32> to vector<128x16xf32>
    %22 = arith.addf %20, %21 : vector<128x16xf32>
    %cst_15 = arith.constant 0.000000e+00 : f32
    %23 = vector.broadcast %cst_15 : f32 to vector<128x16xf32>
    %24 = arith.maximumf %22, %23 : vector<128x16xf32>
    %c3 = arith.constant 3 : index
    %c0_16 = arith.constant 0 : index
    %25 = vector.load %arg2[%c3, %c0_16] : memref<8x256xf32, #tpu.memory_space<vmem>>, vector<1x3xf32>
    %c0_17 = arith.constant 0 : index
    %c0_18 = arith.constant 0 : index
    %26 = vector.load %arg6[%c0_17, %c0_18] : memref<16x3xbf16, #tpu.memory_space<vmem>>, vector<16x3xbf16>
    %27 = arith.truncf %24 : vector<128x16xf32> to vector<128x16xbf16>
    %cst_19 = arith.constant dense<0.000000e+00> : vector<128x3xf32>
    %28 = tpu.matmul %27, %26, %cst_19 {dimension_numbers = #tpu.dot_dimension_numbers<[1], [0], [0], [1], [0, 0, 1, 1], [], []>} : vector<128x16xbf16>, vector<16x3xbf16>, vector<128x3xf32> -> vector<128x3xf32>
    %29 = vector.broadcast %25 : vector<1x3xf32> to vector<128x3xf32>
    %30 = arith.addf %28, %29 : vector<128x3xf32>
    %c0_20 = arith.constant 0 : index
    %c0_21 = arith.constant 0 : index
    %31 = vector.load %arg12[%c0_20, %c0_21] : memref<128x3xf32, #tpu.memory_space<vmem>>, vector<128x3xf32>
    tpu.vector_store %arg12[%c0_20, %c0_21], %30 {strides = array<i32>} : memref<128x3xf32, #tpu.memory_space<vmem>>, vector<128x3xf32>,
    %c0_22 = arith.constant 0 : index
    %c0_23 = arith.constant 0 : index
    %32 = vector.load %arg7[%c0_22, %c0_23] : memref<3x16xbf16, #tpu.memory_space<vmem>>, vector<3x16xbf16>
    %33 = arith.extf %32 : vector<3x16xbf16> to vector<3x16xf32>
    %cst_24 = arith.constant 0.000000e+00 : f32
    %34 = vector.broadcast %cst_24 : f32 to vector<128x16xf32>
    %35 = vector.extract_strided_slice %30 {offsets = [0, 0], sizes = [128, 1], strides = [1, 1]} : vector<128x3xf32> to vector<128x1xf32>
    %36 = vector.extract_strided_slice %33 {offsets = [0, 0], sizes = [1, 16], strides = [1, 1]} : vector<3x16xf32> to vector<1x16xf32>
    %37 = vector.broadcast %35 : vector<128x1xf32> to vector<128x16xf32>
    %38 = vector.broadcast %36 : vector<1x16xf32> to vector<128x16xf32>
    %39 = arith.mulf %37, %38 : vector<128x16xf32>
    %40 = arith.addf %34, %39 : vector<128x16xf32>
    %41 = vector.extract_strided_slice %30 {offsets = [0, 1], sizes = [128, 1], strides = [1, 1]} : vector<128x3xf32> to vector<128x1xf32>
    %42 = vector.extract_strided_slice %33 {offsets = [1, 0], sizes = [1, 16], strides = [1, 1]} : vector<3x16xf32> to vector<1x16xf32>
    %43 = vector.broadcast %41 : vector<128x1xf32> to vector<128x16xf32>
    %44 = vector.broadcast %42 : vector<1x16xf32> to vector<128x16xf32>
    %45 = arith.mulf %43, %44 : vector<128x16xf32>
    %46 = arith.addf %40, %45 : vector<128x16xf32>
    %47 = vector.extract_strided_slice %30 {offsets = [0, 2], sizes = [128, 1], strides = [1, 1]} : vector<128x3xf32> to vector<128x1xf32>
    %48 = vector.extract_strided_slice %33 {offsets = [2, 0], sizes = [1, 16], strides = [1, 1]} : vector<3x16xf32> to vector<1x16xf32>
    %49 = vector.broadcast %47 : vector<128x1xf32> to vector<128x16xf32>
    %50 = vector.broadcast %48 : vector<1x16xf32> to vector<128x16xf32>
    %51 = arith.mulf %49, %50 : vector<128x16xf32>
    %52 = arith.addf %46, %51 : vector<128x16xf32>
    %c4 = arith.constant 4 : index
    %c0_25 = arith.constant 0 : index
    %53 = vector.load %arg2[%c4, %c0_25] : memref<8x256xf32, #tpu.memory_space<vmem>>, vector<1x16xf32>
    %54 = vector.broadcast %53 : vector<1x16xf32> to vector<128x16xf32>
    %55 = arith.addf %52, %54 : vector<128x16xf32>
    %cst_26 = arith.constant 0.000000e+00 : f32
    %56 = vector.broadcast %cst_26 : f32 to vector<128x16xf32>
    %57 = arith.maximumf %55, %56 : vector<128x16xf32>
    %c5 = arith.constant 5 : index
    %c0_27 = arith.constant 0 : index
    %58 = vector.load %arg2[%c5, %c0_27] : memref<8x256xf32, #tpu.memory_space<vmem>>, vector<1x64xf32>
    %c0_28 = arith.constant 0 : index
    %c0_29 = arith.constant 0 : index
    %59 = vector.load %arg8[%c0_28, %c0_29] : memref<16x64xbf16, #tpu.memory_space<vmem>>, vector<16x64xbf16>
    %60 = arith.truncf %57 : vector<128x16xf32> to vector<128x16xbf16>
    %cst_30 = arith.constant dense<0.000000e+00> : vector<128x64xf32>
    %61 = tpu.matmul %60, %59, %cst_30 {dimension_numbers = #tpu.dot_dimension_numbers<[1], [0], [0], [1], [0, 0, 1, 1], [], []>} : vector<128x16xbf16>, vector<16x64xbf16>, vector<128x64xf32> -> vector<128x64xf32>
    %62 = vector.broadcast %58 : vector<1x64xf32> to vector<128x64xf32>
    %63 = arith.addf %61, %62 : vector<128x64xf32>
    %cst_31 = arith.constant 0.000000e+00 : f32
    %64 = vector.broadcast %cst_31 : f32 to vector<128x64xf32>
    %65 = arith.maximumf %63, %64 : vector<128x64xf32>
    %c6 = arith.constant 6 : index
    %c0_32 = arith.constant 0 : index
    %66 = vector.load %arg2[%c6, %c0_32] : memref<8x256xf32, #tpu.memory_space<vmem>>, vector<1x128xf32>
    %c0_33 = arith.constant 0 : index
    %c0_34 = arith.constant 0 : index
    %67 = vector.load %arg9[%c0_33, %c0_34] : memref<64x128xbf16, #tpu.memory_space<vmem>>, vector<64x128xbf16>
    %68 = arith.truncf %65 : vector<128x64xf32> to vector<128x64xbf16>
    %cst_35 = arith.constant dense<0.000000e+00> : vector<128x128xf32>
    %69 = tpu.matmul %68, %67, %cst_35 {dimension_numbers = #tpu.dot_dimension_numbers<[1], [0], [0], [1], [0, 0, 1, 1], [], []>} : vector<128x64xbf16>, vector<64x128xbf16>, vector<128x128xf32> -> vector<128x128xf32>
    %70 = vector.broadcast %66 : vector<1x128xf32> to vector<128x128xf32>
    %71 = arith.addf %69, %70 : vector<128x128xf32>
    %cst_36 = arith.constant 0.000000e+00 : f32
    %72 = vector.broadcast %cst_36 : f32 to vector<128x128xf32>
    %73 = arith.maximumf %71, %72 : vector<128x128xf32>
    %c7 = arith.constant 7 : index
    %c0_37 = arith.constant 0 : index
    %74 = vector.load %arg2[%c7, %c0_37] : memref<8x256xf32, #tpu.memory_space<vmem>>, vector<1x256xf32>
    %c0_38 = arith.constant 0 : index
    %c0_39 = arith.constant 0 : index
    %75 = vector.load %arg10[%c0_38, %c0_39] : memref<128x256xbf16, #tpu.memory_space<vmem>>, vector<128x256xbf16>
    %76 = arith.truncf %73 : vector<128x128xf32> to vector<128x128xbf16>
    %cst_40 = arith.constant dense<0.000000e+00> : vector<128x256xf32>
    %77 = tpu.matmul %76, %75, %cst_40 {dimension_numbers = #tpu.dot_dimension_numbers<[1], [0], [0], [1], [0, 0, 1, 1], [], []>} : vector<128x128xbf16>, vector<128x256xbf16>, vector<128x256xf32> -> vector<128x256xf32>
    %78 = vector.broadcast %74 : vector<1x256xf32> to vector<128x256xf32>
    %79 = arith.addf %77, %78 : vector<128x256xf32>
    %80 = arith.negf %79 : vector<128x256xf32>
    %81 = math.exp %80 : vector<128x256xf32>
    %cst_41 = arith.constant 1.000000e+00 : f32
    %82 = vector.broadcast %cst_41 : f32 to vector<128x256xf32>
    %83 = arith.addf %82, %81 : vector<128x256xf32>
    %84 = arith.divf %82, %83 : vector<128x256xf32>
    %c0_42 = arith.constant 0 : index
    %c0_43 = arith.constant 0 : index
    %85 = vector.load %arg11[%c0_42, %c0_43] : memref<128x256xf32, #tpu.memory_space<vmem>>, vector<128x256xf32>
    tpu.vector_store %arg11[%c0_42, %c0_43], %84 {strides = array<i32>} : memref<128x256xf32, #tpu.memory_space<vmem>>, vector<128x256xf32>,
    return
  }
  func.func @transform_0(%arg0: i32) -> (i32, i32) {
    %c0_i32 = arith.constant 0 : i32
    %c0_i32_0 = arith.constant 0 : i32
    return %arg0, %c0_i32 : i32, i32
  }
  func.func @transform_1(%arg0: i32) -> (i32, i32) {
    %c0_i32 = arith.constant 0 : i32
    %c0_i32_0 = arith.constant 0 : i32
    %c0_i32_1 = arith.constant 0 : i32
    return %c0_i32, %c0_i32_0 : i32, i32
  }
  func.func @transform_2(%arg0: i32) -> (i32, i32) {
    %c0_i32 = arith.constant 0 : i32
    %c0_i32_0 = arith.constant 0 : i32
    %c0_i32_1 = arith.constant 0 : i32
    return %c0_i32, %c0_i32_0 : i32, i32
  }
  func.func @transform_3(%arg0: i32) -> (i32, i32) {
    %c0_i32 = arith.constant 0 : i32
    %c0_i32_0 = arith.constant 0 : i32
    %c0_i32_1 = arith.constant 0 : i32
    return %c0_i32, %c0_i32_0 : i32, i32
  }
  func.func @transform_4(%arg0: i32) -> (i32, i32) {
    %c0_i32 = arith.constant 0 : i32
    %c0_i32_0 = arith.constant 0 : i32
    %c0_i32_1 = arith.constant 0 : i32
    return %c0_i32, %c0_i32_0 : i32, i32
  }
  func.func @transform_5(%arg0: i32) -> (i32, i32) {
    %c0_i32 = arith.constant 0 : i32
    %c0_i32_0 = arith.constant 0 : i32
    %c0_i32_1 = arith.constant 0 : i32
    return %c0_i32, %c0_i32_0 : i32, i32
  }
  func.func @transform_6(%arg0: i32) -> (i32, i32) {
    %c0_i32 = arith.constant 0 : i32
    %c0_i32_0 = arith.constant 0 : i32
    %c0_i32_1 = arith.constant 0 : i32
    return %c0_i32, %c0_i32_0 : i32, i32
  }
  func.func @transform_7(%arg0: i32) -> (i32, i32) {
    %c0_i32 = arith.constant 0 : i32
    %c0_i32_0 = arith.constant 0 : i32
    %c0_i32_1 = arith.constant 0 : i32
    return %c0_i32, %c0_i32_0 : i32, i32
  }
  func.func @transform_8(%arg0: i32) -> (i32, i32) {
    %c0_i32 = arith.constant 0 : i32
    %c0_i32_0 = arith.constant 0 : i32
    %c0_i32_1 = arith.constant 0 : i32
    return %c0_i32, %c0_i32_0 : i32, i32
  }
  func.func @transform_9(%arg0: i32) -> (i32, i32) {
    %c0_i32 = arith.constant 0 : i32
    %c0_i32_0 = arith.constant 0 : i32
    %c0_i32_1 = arith.constant 0 : i32
    return %c0_i32, %c0_i32_0 : i32, i32
  }
  func.func @transform_10(%arg0: i32) -> (i32, i32) {
    %c0_i32 = arith.constant 0 : i32
    %c0_i32_0 = arith.constant 0 : i32
    return %arg0, %c0_i32 : i32, i32
  }
  func.func @transform_11(%arg0: i32) -> (i32, i32) {
    %c0_i32 = arith.constant 0 : i32
    %c0_i32_0 = arith.constant 0 : i32
    return %arg0, %c0_i32 : i32, i32
  }
}

</mosaic_0001>

<bundles_post_ra>
// kernel: tpu_custom_call.1
= control target key start
LH: loop header
LB: loop body
LE: loop exit
PB: predicated region body
PF: predicated region fallthrough
CT: control target
= control target key end

     0   :  { %s4300_s0 = inlined_call_operand.hbm [shape: f32[256,256], index: 0, kind: input, shape index: {}]   ;;  %s4301_s1 = inlined_call_operand.hbm [shape: f32[8,256], index: 1, kind: input, shape index: {}]   ;;  %s4302_s2 = inlined_call_operand.vmem [shape: bf16[256,128], index: 2, kind: input, shape index: {}]   ;;  %s4303_s3 = inlined_call_operand.vmem [shape: bf16[128,64], index: 3, kind: input, shape index: {}]   ;;  %s4304_s4 = inlined_call_operand.vmem [shape: bf16[64,16], index: 4, kind: input, shape index: {}]   ;;  %s4305_s5 = inlined_call_operand.vmem [shape: bf16[16,3], index: 5, kind: input, shape index: {}]   ;;  %s4306_s6 = inlined_call_operand.hbm [shape: bf16[3,16], index: 6, kind: input, shape index: {}]   ;;  %s4307_s7 = inlined_call_operand.vmem [shape: bf16[16,64], index: 7, kind: input, shape index: {}]   ;;  %s4308_s8 = inlined_call_operand.vmem [shape: bf16[64,128], index: 8, kind: input, shape index: {}]   ;;  %s4309_s9 = inlined_call_operand.hbm [shape: bf16[128,256], index: 9, kind: input, shape index: {}]   ;;  %s4310_s10 = inlined_call_operand.hbm [shape: f32[256,256], index: 10, kind: output, shape index: {0}]   ;;  %s4311_s11 = inlined_call_operand.vmem [shape: f32[256,3], index: 11, kind: output, shape index: {1}]  }
   0x1   :  { %4318 = sst [smem:[#allocation17_spill]] %s4310_s10 }
   0x2   :  { %17 = vsyncpa [#allocation3], 0 }
   0x3   :  { %19 = vsyncpa [#allocation3 + $0x1], 0 }
   0x4   :  { %20 = vsyncpa [#allocation6], 0 }
   0x5   :  { %21 = vsyncpa [#allocation9], 0 }
   0x6   :  { %22 = vsyncpa [#allocation4], 0 }
   0x7   :  { %24 = vsyncpa [#allocation4 + $0x1], 0  ;;  %s3538_s17 = smov 0   ;;  %s3540_s18 = smov 0  }
   0x8   :  { %s3542_s19 = smov 0   ;;  %s3544_s20 = smov 0  }
   0x9 LB: > { %4319 = sst [smem:[#allocation15_spill]] %s3450_s17  ;;  %s3559_s21 = sadd.s32 4294967295, %s3462_s20   ;;  %s3462_s20 = sphi %s3544_s20, %s4343_s20   ;;  %s3458_s19 = sphi %s3542_s19, %s4342_s19   ;;  %s3454_s18 = sphi %s3540_s18, %s4341_s18   ;;  %s3450_s17 = sphi %s3538_s17, %s4340_s17  }
   0xa   : > { %s2562_s22 = sadd.s32 4294967294, %s3462_s20   ;;  %p50_p0 = scmp.ne.s32.totalorder %s3454_s18, %s3450_s17 }
   0xb   : > { %p4313_p1 = scmp.eq.s32.totalorder %s3559_s21, 0  ;;  %p269_p3 = scmp.eq.s32.totalorder %s2562_s22, 1 }
   0xc   : > { %p2563_p5 = scmp.ge.s32.totalorder %s3462_s20, 1  ;;  %p302_p7 = scmp.lt.s32.totalorder %s3462_s20, 3 }
   0xd   : > { %p3568_p4 = por %p4313_p1, %p50_p0  ;;  %p3573_p6 = por %p269_p3, %p50_p0 }
   0xe   : > { %p3578_p8 = pnand %p2563_p5, %p302_p7  ;;  %s3464_s26 = smov [#allocation5]  }
   0xf   : > { %s4320_s23 = scalar_select %p3568_p4, 1, 0 }
  0x10   : > { %s4321_s24 = scalar_select %p3573_p6, 1, 0 }
  0x11   : > { %s4323_s25 = scalar_select %p3578_p8, 1, 0 }
  0x12   : > { %4322 = sst [smem:[#allocation16_spill]] %s4321_s24  ;;  %s315_s27 = sshll.u32 %s3464_s26, 4  ;;  %s316_s27 = int_to_ptr.vmem [resolvable:$true] %s315_s27 }
  0x13   : > { %p2974_p10 = pneg %p3578_p8  ;;  %s3465_s28 = smov [#allocation7]  }
  0x14   : > { %s338_s29 = sshll.u32 %s3465_s28, 4  ;;  %s3466_s12 = smov [#allocation8]   ;;  %s3591_s29 = int_to_ptr.vmem [resolvable:$true] %s338_s29 }
  0x15   : > { %p3587_p11 = pnand %p2974_p10, %p4313_p1  ;;  %s354_s13 = sshll.u32 %s3466_s12, 4  ;;  %s3593_s13 = int_to_ptr.vmem [resolvable:$true] %s354_s13 }
  0x16   : > { %s3274_s16 = scalar_lea.hbm %s4301_s1, 256 }
  0x17   : > { %p3275_p12 = scmp.ne.s32.totalorder %s4301_s1, %s3274_s16  ;;  %p3603_p13 = pneg %p3587_p11 }
  0x18   : > { %p3281_p5 = scmp.lt.u32.totalorder %s3274_s16, %s4301_s1 }
  0x19   : > { %p3277_p0 = pnand %p3603_p13, %p3275_p12 }
  0x1b   : > { %p3278_p3 = pneg %p3277_p0 }
  0x1d   : > { %p3283_p7 = pnand %p3281_p5, %p3278_p3 }
  0x1f   : > { %3286 = shalt.err (!%p3283_p7)
}
  0x20   : > { %s3287_s14 = scalar_lea.vmem %s316_s27, 256  ;;  %p3295_p2 = scmp.lt.s32.totalorder %s316_s27, %s316_s27 }
  0x21   : > { %p3288_p10 = scmp.ne.s32.totalorder %s316_s27, %s3287_s14  ;;  %p3296_p6 = scmp.lt.s32.totalorder %s3287_s14, %s3287_s14 }
  0x23   : > { %p3290_p9 = pnand %p3288_p10, %p3603_p13  ;;  %p3297_p4 = por %p3296_p6, %p3295_p2 }
  0x25   : > { %p3291_p1 = pneg %p3290_p9 }
  0x27   : > { %p3298_p8 = pnand %p3297_p4, %p3291_p1 }
  0x29   : > { %3301 = shalt.err (!%p3298_p8)
}
  0x2a   : > { %2977 = dma.hbm_to_vmem [thread:$0]  (!%p3587_p11), %s4301_s1, 256, %s316_s27, [#allocation6]  }
  0x2b   : > { %s3302_s26 = scalar_lea.hbm %s4306_s6, 32 }
  0x2c   : > { %p3303_p9 = scmp.ne.s32.totalorder %s4306_s6, %s3302_s26  ;;  %p3309_p1 = scmp.lt.u32.totalorder %s3302_s26, %s4306_s6 }
  0x2e   : > { %p3305_p12 = pnand %p3303_p9, %p3603_p13 }
  0x30   : > { %p3306_p2 = pneg %p3305_p12 }
  0x32   : > { %p3311_p4 = pnand %p3309_p1, %p3306_p2 }
  0x34   : > { %3314 = shalt.err (!%p3311_p4)
}
  0x35   : > { %s3315_s27 = scalar_lea.vmem %s3591_s29, 32  ;;  %p3323_p3 = scmp.lt.s32.totalorder %s3591_s29, %s3591_s29 }
  0x36   : > { %p3316_p6 = scmp.ne.s32.totalorder %s3591_s29, %s3315_s27  ;;  %p3324_p5 = scmp.lt.s32.totalorder %s3315_s27, %s3315_s27 }
  0x38   : > { %p3318_p8 = pnand %p3316_p6, %p3603_p13  ;;  %p3325_p7 = por %p3324_p5, %p3323_p3 }
  0x3a   : > { %p3319_p0 = pneg %p3318_p8 }
  0x3c   : > { %p3326_p10 = pnand %p3325_p7, %p3319_p0 }
  0x3e   : > { %3329 = shalt.err (!%p3326_p10)
}
  0x3f   : > { %2980 = dma.hbm_to_vmem [thread:$0]  (!%p3587_p11), %s4306_s6, 32, %s3591_s29, [#allocation6]  }
  0x40   : > { %s3330_s24 = scalar_lea.hbm %s4309_s9, 2048 }
  0x41   : > { %p3331_p9 = scmp.ne.s32.totalorder %s4309_s9, %s3330_s24  ;;  %p3337_p1 = scmp.lt.u32.totalorder %s3330_s24, %s4309_s9 }
  0x43   : > { %p3333_p12 = pnand %p3331_p9, %p3603_p13 }
  0x45   : > { %p3334_p2 = pneg %p3333_p12 }
  0x47   : > { %p3339_p4 = pnand %p3337_p1, %p3334_p2 }
  0x49   : > { %3342 = shalt.err (!%p3339_p4)
}
  0x4a   : > { %s3343_s29 = scalar_lea.vmem %s3593_s13, 2048  ;;  %p3351_p3 = scmp.lt.s32.totalorder %s3593_s13, %s3593_s13 }
  0x4b   : > { %p3344_p6 = scmp.ne.s32.totalorder %s3593_s13, %s3343_s29  ;;  %p3352_p5 = scmp.lt.s32.totalorder %s3343_s29, %s3343_s29 }
  0x4d   : > { %p3346_p8 = pnand %p3344_p6, %p3603_p13  ;;  %p3353_p7 = por %p3352_p5, %p3351_p3 }
  0x4f   : > { %p3347_p0 = pneg %p3346_p8 }
  0x51   : > { %p3354_p10 = pnand %p3353_p7, %p3347_p0 }
  0x53   : > { %3357 = shalt.err (!%p3354_p10)
}
  0x54   : > { %s3467_s27 = smov 128   ;;  %s3468_s28 = smov 8  }
  0x55   : > { %2983 = dma.hbm_to_vmem [thread:$0]  (!%p3587_p11), %s4309_s9, 2048, %s3593_s13, [#allocation9], %s3467_s27, %s3467_s27, %s3468_s28  }
  0x56   : > { %s3666_s15 = sadd.s32 1, %s3462_s20   ;;  %s37_s24 = sadd.s32 1, %s3458_s19 }
  0x57   : > { %s34_s22 = ssub.s32 %s3462_s20, %s3666_s15  ;;  %p44_p9 = scmp.ne.s32.totalorder %s3458_s19, %s3454_s18 }
  0x58   : > { %p35_p13 = scmp.eq.s32.totalorder %s34_s22, 0  ;;  %p45_p12 = scmp.eq.s32.totalorder %s3462_s20, 0 }
  0x59   : > { %p2995_p2 = scmp.lt.s32.totalorder %s3462_s20, 2  ;;  %p4326_p4 = scmp.eq.s32.totalorder %s3559_s21, 1 }
  0x5a   : > { %s3676_s16 = scalar_select %p35_p13, %s3458_s19, %s37_s24  }
  0x5b   : > { %p46_p1 = por %p45_p12, %p44_p9  ;;  %p3680_p6 = por %p4326_p4, %p44_p9 }
  0x5c   : > { %s368_s30 = sand.u32 1, %s3458_s19   ;;  %s2701_s12 = sshll.u32 %s3462_s20, 12 }
  0x5d   : > { %s2568_s13 = sshll.u32 %s368_s30, 8  ;;  %s3689_s27 = scalar_lea.hbm %s4300_s0, %s2701_s12 }
  0x5e   : > { %s372_s28 = scalar_lea.vmem [#allocation2], %s2568_s13  ;;  %p3691_p11 = pnand %p2995_p2, %p46_p1 }
  0x5f   : > { %s380_s10 = sshll.u32 %s372_s28, 4  ;;  %s3697_s22 = scalar_lea.sflag [#allocation3], %s368_s30  ;;  %s3695_s10 = int_to_ptr.vmem [resolvable:$true] %s380_s10 }
  0x60   : > { %s3358_s24 = scalar_lea.hbm %s3689_s27, 4096  ;;  %p3360_p0 = pneg %p3691_p11 }
  0x61   : > { %p3359_p8 = scmp.ne.s32.totalorder %s3689_s27, %s3358_s24  ;;  %s3363_s14 = scalar_lea.hbm %s4300_s0, 8192 }
  0x62   : > { %p3364_p7 = scmp.lt.u32.totalorder %s3689_s27, %s4300_s0  ;;  %p3365_p10 = scmp.lt.u32.totalorder %s3363_s14, %s3358_s24 }
  0x63   : > { %p3361_p3 = pnand %p3360_p0, %p3359_p8  ;;  %p3367_p9 = scmp.lt.u32.totalorder %s3358_s24, %s3689_s27 }
  0x64   : > { %p3366_p13 = por %p3365_p10, %p3364_p7 }
  0x65   : > { %p3362_p5 = pneg %p3361_p3 }
  0x66   : > { %p3368_p12 = por %p3367_p9, %p3366_p13 }
  0x68   : > { %p3369_p2 = pnand %p3368_p12, %p3362_p5 }
  0x6a   : > { %3372 = shalt.err (!%p3369_p2)
}
  0x6b   : > { %s3373_s30 = scalar_lea.vmem %s3695_s10, 4096  ;;  %s3469_s12 = smov [#allocation2]  }
  0x6c   : > { %p3374_p1 = scmp.ne.s32.totalorder %s3695_s10, %s3373_s30  ;;  %s3378_s13 = sshll.u32 %s3469_s12, 4  ;;  %s3379_s13 = int_to_ptr.vmem [resolvable:$false] %s3378_s13 }
  0x6d   : > { %s3380_s29 = scalar_lea.vmem %s3379_s13, 8192  ;;  %p3381_p3 = scmp.lt.s32.totalorder %s3695_s10, %s3379_s13 }
  0x6e   : > { %p3376_p4 = pnand %p3374_p1, %p3360_p0  ;;  %p3382_p7 = scmp.lt.s32.totalorder %s3380_s29, %s3373_s30 }
  0x70   : > { %p3377_p8 = pneg %p3376_p4  ;;  %p3383_p10 = por %p3382_p7, %p3381_p3 }
  0x72   : > { %p3384_p13 = pnand %p3383_p10, %p3377_p8 }
  0x74   : > { %3387 = shalt.err (!%p3384_p13)
}
  0x75   : > { %s3470_s24 = smov 256   ;;  %s3471_s14 = smov 16  }
  0x76   : > { %2987 = dma.hbm_to_vmem [thread:$0]  (!%p3691_p11), %s3689_s27, 4096, %s3695_s10, %s3697_s22, %s3470_s24, %s3470_s24, %s3471_s14  }
  0x77   : > { %p4329_p0 = scmp.ne.s32.totalorder %s4323_s25, 0 }
  0x78   : > { %s3728_s28 = sand.u32 (!%p4329_p0), 1, %s3454_s18   ;;  %p4330_p5 = scmp.ne.s32.totalorder (!%p4329_p0), %s4320_s23, 0 }
  0x79   : > { %392 = sbr.rel (%p4329_p0) target bundleno = 2043 (0x7fb), region = 60  ;;  %s2573_s30 = sshll.u32 (!%p4329_p0), %s3728_s28, 8 }
  0x7a   : > { %s395_s12 = scalar_lea.sflag (!%p4329_p0), [#allocation3], %s3728_s28  ;;  %s3734_s13 = scalar_lea.vmem (!%p4329_p0), [#allocation2], %s2573_s30 }
  0x80   : > { %3433 = dma.done.wait (%p4330_p5), %s395_s12, 4096  }
  0x81   : > { %3435 = vsyncadd (%p4330_p5), %s395_s12, 4294963200  ;;  %p4331_p11 = scmp.eq.s32.totalorder %s3559_s21, 0 }
  0x83   : > { %3437 = dma.done.wait (%p4331_p11), [#allocation6], 288   ;;  %p4332_p9 = pmov %p4331_p11 }
  0x85   : > { %3439 = vsyncadd (%p4332_p9), [#allocation6], 4294967008  ;;  %p4333_p12 = pmov %p4332_p9 }
  0x86   : > { %p4334_p2 = pmov %p4332_p9 }
  0x87   : > { %3441 = dma.done.wait (%p4333_p12), [#allocation9], 2048  }
  0x88   : > { %3443 = vsyncadd (%p4334_p2), [#allocation9], 4294965248  ;;  %v3088_v0 = vld [vmem:[%s4302_s2 + $0x40] sm:$0xff]   ;;  %v3090_v2 = vld [vmem:[%s4302_s2 + $0x48] sm:$0xff]   ;;  %vm980_vm0 = vcmask 523264   ;;  %vm1135_vm1 = vcmask 130048  }
  0x89   : > { %v3089_v1 = vld [vmem:[%s4302_s2] sm:$0xff]   ;;  %2704 = vmatprep.subr.bf16.mxu0 %v3088_v0  ;;  %v3091_v3 = vld [vmem:[%s4302_s2 + $0x8] sm:$0xff]   ;;  %v3092_v4 = vld [vmem:[%s4302_s2 + $0x50] sm:$0xff]   ;;  %s2578_s24 = sshll.u32 %s3559_s21, 4  ;;  %vm1257_vm2 = vcmask 23552   ;;  %s4335_s23 = sld [smem:[#allocation17_spill]] }
  0x8a   : > { %2705 = vmatpush3.bf16.msra.mxu0 %v3089_v1  ;;  %v3093_v5 = vld [vmem:[%s4302_s2 + $0x10] sm:$0xff]   ;;  %v3094_v6 = vld [vmem:[%s4302_s2 + $0x58] sm:$0xff]   ;;  %v3096_v8 = vld [vmem:[%s4302_s2 + $0x60] sm:$0xff]   ;;  %p457_p1 = scmp.lt.s32.totalorder %s2578_s24, 31 }
  0x8b   : > { %2706 = vmatprep.subr.bf16.mxu0 %v3090_v2  ;;  %v3095_v7 = vld [vmem:[%s4302_s2 + $0x18] sm:$0xff]   ;;  %v3097_v9 = vld [vmem:[%s4302_s2 + $0x20] sm:$0xff]   ;;  %v3098_v10 = vld [vmem:[%s4302_s2 + $0x68] sm:$0xff]  }
  0x8c   : > { %v464_v11 = vld [vmem:[%s3734_s13 + $0x8] sm:$0xff]  ;;  %v466_v12 = vld [vmem:[%s3734_s13 + $0x18] sm:$0xff]  ;;  %v3100_v15 = vld [vmem:[%s4302_s2 + $0x70] sm:$0xff]   ;;  %s4345_s24 = smov (!%p457_p1, %s2578_s24), 31 }
  0x8d   : > { %v529_v13 = vpack.c.bf16 %v466_v12, %v464_v11  ;;  %v3099_v14 = vld [vmem:[%s4302_s2 + $0x28] sm:$0xff]   ;;  %v3101_v16 = vld [vmem:[%s4302_s2 + $0x30] sm:$0xff]   ;;  %v3102_v17 = vld [vmem:[%s4302_s2 + $0x78] sm:$0xff]   ;;  %s2579_s14 = sshll.u32 %s4345_s24, 3  ;;  %s3475_s24 = smov [#allocation10]  }
  0x8e   : > { %2707 = vmatpush3.bf16.msra.mxu0 %v3091_v3  ;;  %v3103_v18 = vld [vmem:[%s4302_s2 + $0x38] sm:$0xff]   ;;  %v463_v19 = vld [vmem:[%s3734_s13] sm:$0xff]  ;;  %v465_v20 = vld [vmem:[%s3734_s13 + $0x10] sm:$0xff]  ;;  %s3913_s25 = scalar_lea.vmem %s4311_s11, %s2579_s14  ;;  %s3392_s14 = sshll.u32 %s3475_s24, 4  ;;  %s3393_s14 = int_to_ptr.vmem [resolvable:$false] %s3392_s14 }
  0x8f   : > { %2708 = vmatprep.subr.bf16.mxu0 %v3092_v4  ;;  %672 = vmatprep.mubr.bf16.mxu0 %v529_v13  ;;  %v468_v21 = vld [vmem:[%s3734_s13 + $0x28] sm:$0xff]  ;;  %v3104_v22 = vld [vmem:[%s4303_s3] sm:$0xff]   ;;  %v470_v23 = vld [vmem:[%s3734_s13 + $0x38] sm:$0xff]  ;;  %v528_v25 = vpack.c.bf16 %v465_v20, %v463_v19 }
  0x90   : > { %v3105_v24 = vld [vmem:[%s4303_s3 + $0x8] sm:$0xff]   ;;  %2942 = vmatprep.subr.bf16.mxu1 %v3104_v22  ;;  %v531_v26 = vpack.c.bf16 %v470_v23, %v468_v21  ;;  %v3106_v27 = vld [vmem:[%s4303_s3 + $0x10] sm:$0xff]   ;;  %v467_v28 = vld [vmem:[%s3734_s13 + $0x20] sm:$0xff] }
  0x91   : > { %2950 = vmatpush3.bf16.msra.mxu1 %v3104_v22  ;;  %v469_v29 = vld [vmem:[%s3734_s13 + $0x30] sm:$0xff]  ;;  %v472_v30 = vld [vmem:[%s3734_s13 + $0x48] sm:$0xff]  ;;  %v474_v31 = vld [vmem:[%s3734_s13 + $0x58] sm:$0xff] }
  0x92   : > { %2709 = vmatpush3.bf16.msra.mxu0 %v3093_v5  ;;  %2943 = vmatprep.subr.bf16.mxu1 %v3105_v24  ;;  %v3107_v32 = vld [vmem:[%s4303_s3 + $0x18] sm:$0xff]   ;;  %v530_v33 = vpack.c.bf16 %v469_v29, %v467_v28  ;;  %v533_v34 = vpack.c.bf16 %v474_v31, %v472_v30  ;;  %v3108_v35 = vld [vmem:[%s4303_s3 + $0x20] sm:$0xff]   ;;  %v473_v37 = vld [vmem:[%s3734_s13 + $0x50] sm:$0xff] }
  0x93   : > { %2710 = vmatprep.subr.bf16.mxu0 %v3094_v6  ;;  %v471_v36 = vld [vmem:[%s3734_s13 + $0x40] sm:$0xff]  ;;  %v476_v38 = vld [vmem:[%s3734_s13 + $0x68] sm:$0xff]  ;;  %v478_v39 = vld [vmem:[%s3734_s13 + $0x78] sm:$0xff] }
  0x94   : > { %v3109_v40 = vld [vmem:[%s4303_s3 + $0x28] sm:$0xff]   ;;  %v532_v41 = vpack.c.bf16 %v473_v37, %v471_v36  ;;  %v535_v42 = vpack.c.bf16 %v478_v39, %v476_v38  ;;  %v475_v43 = vld [vmem:[%s3734_s13 + $0x60] sm:$0xff]  ;;  %v477_v44 = vld [vmem:[%s3734_s13 + $0x70] sm:$0xff] }
  0x95   : > { %2951 = vmatpush3.bf16.msra.mxu1 %v3105_v24  ;;  %v480_v45 = vld [vmem:[%s3734_s13 + $0x88] sm:$0xff]  ;;  %v482_v46 = vld [vmem:[%s3734_s13 + $0x98] sm:$0xff]  ;;  %v534_v47 = vpack.c.bf16 %v477_v44, %v475_v43  ;;  %v479_v49 = vld [vmem:[%s3734_s13 + $0x80] sm:$0xff] }
  0x96   : > { %2711 = vmatpush3.bf16.msra.mxu0 %v3095_v7  ;;  %2944 = vmatprep.subr.bf16.mxu1 %v3106_v27  ;;  %v537_v48 = vpack.c.bf16 %v482_v46, %v480_v45  ;;  %v481_v50 = vld [vmem:[%s3734_s13 + $0x90] sm:$0xff]  ;;  %v484_v51 = vld [vmem:[%s3734_s13 + $0xa8] sm:$0xff]  ;;  %v486_v52 = vld [vmem:[%s3734_s13 + $0xb8] sm:$0xff] }
  0x97   : > { %2712 = vmatprep.subr.bf16.mxu0 %v3096_v8  ;;  %v536_v53 = vpack.c.bf16 %v481_v50, %v479_v49  ;;  %v539_v54 = vpack.c.bf16 %v486_v52, %v484_v51  ;;  %v483_v55 = vld [vmem:[%s3734_s13 + $0xa0] sm:$0xff]  ;;  %v485_v56 = vld [vmem:[%s3734_s13 + $0xb0] sm:$0xff]  ;;  %v488_v57 = vld [vmem:[%s3734_s13 + $0xc8] sm:$0xff] }
  0x98   : > { %v490_v58 = vld [vmem:[%s3734_s13 + $0xd8] sm:$0xff]  ;;  %v538_v59 = vpack.c.bf16 %v485_v56, %v483_v55  ;;  %v487_v61 = vld [vmem:[%s3734_s13 + $0xc0] sm:$0xff]  ;;  %v489_v62 = vld [vmem:[%s3734_s13 + $0xd0] sm:$0xff] }
  0x99   : > { %2952 = vmatpush3.bf16.msra.mxu1 %v3106_v27  ;;  %v541_v60 = vpack.c.bf16 %v490_v58, %v488_v57  ;;  %v492_v63 = vld [vmem:[%s3734_s13 + $0xe8] sm:$0xff]  ;;  %v494_v0 = vld [vmem:[%s3734_s13 + $0xf8] sm:$0xff]  ;;  %v540_v1 = vpack.c.bf16 %v489_v62, %v487_v61  ;;  %v491_v3 = vld [vmem:[%s3734_s13 + $0xe0] sm:$0xff] }
  0x9a   : > { %2713 = vmatpush3.bf16.msra.mxu0 %v3097_v9  ;;  %2945 = vmatprep.subr.bf16.mxu1 %v3107_v32  ;;  %v543_v2 = vpack.c.bf16 %v494_v0, %v492_v63  ;;  %v493_v4 = vld [vmem:[%s3734_s13 + $0xf0] sm:$0xff]  ;;  %v3111_v7 = vld [vmem:[%s4303_s3 + $0x38] sm:$0xff]   ;;  %v3855_v8 = vld [vmem:[%s4304_s4] sm:$0xff]   ;;  %s3394_s13 = scalar_lea.vmem %s3393_s14, 8192 }
  0x9b   : > { %2714 = vmatprep.subr.bf16.mxu0 %v3098_v10  ;;  %v542_v5 = vpack.c.bf16 %v493_v4, %v491_v3  ;;  %v3110_v6 = vld [vmem:[%s4303_s3 + $0x30] sm:$0xff]   ;;  %v3858_v10 = vld [vmem:[#allocation5] ss:$0 sm:$0xff] }
  0x9d   : > { %2953 = vmatpush3.bf16.msra.mxu1 %v3107_v32 }
  0x9e   : > { %2715 = vmatpush3.bf16.msra.mxu0 %v3099_v14  ;;  %2946 = vmatprep.subr.bf16.mxu1 %v3108_v35 }
  0x9f   : > { %2716 = vmatprep.subr.bf16.mxu0 %v3100_v15 }
  0xa1   : > { %2954 = vmatpush3.bf16.msra.mxu1 %v3108_v35 }
  0xa2   : > { %2717 = vmatpush3.bf16.msra.mxu0 %v3101_v16  ;;  %2947 = vmatprep.subr.bf16.mxu1 %v3109_v40 }
  0xa3   : > { %2718 = vmatprep.subr.bf16.mxu0 %v3102_v17 }
  0xa5   : > { %2955 = vmatpush3.bf16.msra.mxu1 %v3109_v40 }
  0xa6   : > { %2719 = vmatpush3.bf16.msra.mxu0 %v3103_v18  ;;  %2948 = vmatprep.subr.bf16.mxu1 %v3110_v6 }
  0xa7   : > { %2826 = vmatprep.subr.bf16.mxu0 %v3104_v22 }
  0xa9   : > { %673 = vmatmul.mubr.bf16.vlgmr.msra.gmra.mrb[0].mxu0 %v528_v25  ;;  %2956 = vmatpush3.bf16.msra.mxu1 %v3110_v6 }
  0xaa   : > { %680 = vmatprep.mubr.bf16.mxu0 %v531_v26  ;;  %2827 = vmatpush3.bf16.msra.mxu0 %v3104_v22 }
  0xab   : > { %2828 = vmatprep.subr.bf16.mxu0 %v3105_v24  ;;  %2949 = vmatprep.subr.bf16.mxu1 %v3111_v7 }
  0xad   : > { %2957 = vmatpush3.bf16.msra.mxu1 %v3111_v7 }
  0xae   : > { %2829 = vmatpush3.bf16.msra.mxu0 %v3105_v24  ;;  %2858 = vmatprep.subr.bf16.mxu1 %v3855_v8 }
  0xaf   : > { %2830 = vmatprep.subr.bf16.mxu0 %v3106_v27 }
  0xb1   : > { %681 = vmatmul.mubr.bf16.gmra.mrb[4].mxu0 %v530_v33 }
  0xb2   : > { %688 = vmatprep.mubr.bf16.mxu0 %v533_v34  ;;  %2831 = vmatpush3.bf16.msra.mxu0 %v3106_v27 }
  0xb3   : > { %2832 = vmatprep.subr.bf16.mxu0 %v3107_v32 }
  0xb6   : > { %2833 = vmatpush3.bf16.msra.mxu0 %v3107_v32 }
  0xb7   : > { %2834 = vmatprep.subr.bf16.mxu0 %v3108_v35 }
  0xb9   : > { %689 = vmatmul.mubr.bf16.gmra.mrb[8].mxu0 %v532_v41 }
  0xba   : > { %696 = vmatprep.mubr.bf16.mxu0 %v535_v42  ;;  %2835 = vmatpush3.bf16.msra.mxu0 %v3108_v35 }
  0xbb   : > { %2836 = vmatprep.subr.bf16.mxu0 %v3109_v40 }
  0xbe   : > { %2837 = vmatpush3.bf16.msra.mxu0 %v3109_v40 }
  0xbf   : > { %2838 = vmatprep.subr.bf16.mxu0 %v3110_v6 }
  0xc1   : > { %697 = vmatmul.mubr.bf16.gmra.mrb[12].mxu0 %v534_v47 }
  0xc2   : > { %704 = vmatprep.mubr.bf16.mxu0 %v537_v48  ;;  %2839 = vmatpush3.bf16.msra.mxu0 %v3110_v6 }
  0xc3   : > { %2840 = vmatprep.subr.bf16.mxu0 %v3111_v7 }
  0xc6   : > { %2841 = vmatpush3.bf16.msra.mxu0 %v3111_v7 }
  0xc9   : > { %705 = vmatmul.mubr.bf16.gmra.mrb[16].mxu0 %v536_v53 }
  0xca   : > { %712 = vmatprep.mubr.bf16.mxu0 %v539_v54 }
  0xd1   : > { %713 = vmatmul.mubr.bf16.gmra.mrb[20].mxu0 %v538_v59 }
  0xd2   : > { %720 = vmatprep.mubr.bf16.mxu0 %v541_v60 }
  0xd9   : > { %721 = vmatmul.mubr.bf16.gmra.mrb[24].mxu0 %v540_v1 }
  0xda   : > { %728 = vmatprep.mubr.bf16.mxu0 %v543_v2 }
  0xe1   : > { %729 = vmatmul.mubr.bf16.gmra.mrb[28].mxu0 %v542_v5 }
 0x17c   : > { %v2720_v9 = vpop.f32.mrb[0].mxu0 }
 0x17d   : > { %v2721_v11 = vpop.f32.mrb[1].mxu0 }
 0x17e   : > { %v2722_v12 = vadd.f32 %v2721_v11, %v2720_v9  ;;  %v2723_v13 = vpop.f32.mrb[2].mxu0 }
 0x17f   : > { %v2724_v14 = vpop.f32.mrb[3].mxu0 }
 0x180   : > { %v675_v15 = vadd.f32 %v2722_v12, %v3858_v10  ;;  %v2725_v16 = vadd.f32 %v2724_v14, %v2723_v13 }
 0x182   : > { %v678_v17 = vadd.f32 %v2725_v16, %v3858_v10  ;;  %v737_v18 = vmax.f32 %v675_v15, 0.0 }
 0x184   : > { %v738_v19 = vmax.f32 %v678_v17, 0.0  ;;  %v2726_v20 = vpop.f32.mrb[4].mxu0 }
 0x185   : > { %v2727_v21 = vpop.f32.mrb[5].mxu0 }
 0x186   : > { %v2728_v22 = vadd.f32 %v2727_v21, %v2726_v20  ;;  %v2729_v23 = vpop.f32.mrb[6].mxu0  ;;  %v770_v24 = vpack.c.bf16 %v738_v19, %v737_v18  ;;  %v3113_v18 = vld [vmem:[%s4304_s4 + $0x8] sm:$0xff]  }
 0x187   : > { %v2730_v25 = vpop.f32.mrb[7].mxu0 }
 0x188   : > { %v683_v26 = vadd.f32 %v2728_v22, %v3858_v10  ;;  %v2731_v27 = vadd.f32 %v2730_v25, %v2729_v23  ;;  %2842 = vmatprep.mubr.bf16.mxu0 %v770_v24 }
 0x18a   : > { %v686_v28 = vadd.f32 %v2731_v27, %v3858_v10  ;;  %v739_v29 = vmax.f32 %v683_v26, 0.0 }
 0x18c   : > { %v740_v30 = vmax.f32 %v686_v28, 0.0  ;;  %v2732_v31 = vpop.f32.mrb[8].mxu0 }
 0x18d   : > { %v2733_v32 = vpop.f32.mrb[9].mxu0 }
 0x18e   : > { %v771_v33 = vpack.c.bf16 %v740_v30, %v739_v29  ;;  %v2734_v34 = vadd.f32 %v2733_v32, %v2732_v31  ;;  %v2735_v35 = vpop.f32.mrb[10].mxu0 }
 0x18f   : > { %v2736_v36 = vpop.f32.mrb[11].mxu0 }
 0x190   : > { %2843 = vmatmul.mubr.bf16.vlgmr.msra.gmra.mrb[32].mxu0 %v771_v33  ;;  %v691_v37 = vadd.f32 %v2734_v34, %v3858_v10  ;;  %v2737_v38 = vadd.f32 %v2736_v36, %v2735_v35  ;;  %v3114_v36 = vld [vmem:[%s4304_s4 + $0x10] sm:$0xff]  }
 0x192   : > { %v741_v39 = vmax.f32 %v691_v37, 0.0  ;;  %v694_v40 = vadd.f32 %v2737_v38, %v3858_v10  ;;  %v3115_v37 = vld [vmem:[%s4304_s4 + $0x18] sm:$0xff]   ;;  %v3116_v38 = vld [vmem:[%s4305_s5] sm:$0xff]  }
 0x193   : > { %2882 = vmatprep.subr.bf16.mxu0 %v3116_v38 }
 0x194   : > { %v742_v41 = vmax.f32 %v694_v40, 0.0  ;;  %v2738_v42 = vpop.f32.mrb[12].mxu0  ;;  %2883 = vmatpush3.bf16.msra.mxu0 %v3116_v38 }
 0x195   : > { %v2739_v43 = vpop.f32.mrb[13].mxu0 }
 0x196   : > { %v2740_v44 = vadd.f32 %v2739_v43, %v2738_v42  ;;  %v2741_v45 = vpop.f32.mrb[14].mxu0  ;;  %v772_v46 = vpack.c.bf16 %v742_v41, %v741_v39 }
 0x197   : > { %v2742_v47 = vpop.f32.mrb[15].mxu0 }
 0x198   : > { %v699_v48 = vadd.f32 %v2740_v44, %v3858_v10  ;;  %v2743_v49 = vadd.f32 %v2742_v47, %v2741_v45  ;;  %2846 = vmatprep.mubr.bf16.mxu0 %v772_v46 }
 0x19a   : > { %v743_v50 = vmax.f32 %v699_v48, 0.0  ;;  %v702_v51 = vadd.f32 %v2743_v49, %v3858_v10 }
 0x19c   : > { %v744_v52 = vmax.f32 %v702_v51, 0.0  ;;  %v2744_v53 = vpop.f32.mrb[16].mxu0 }
 0x19d   : > { %v2745_v54 = vpop.f32.mrb[17].mxu0 }
 0x19e   : > { %v773_v55 = vpack.c.bf16 %v744_v52, %v743_v50  ;;  %v2746_v56 = vadd.f32 %v2745_v54, %v2744_v53  ;;  %v2747_v57 = vpop.f32.mrb[18].mxu0 }
 0x19f   : > { %v2748_v58 = vpop.f32.mrb[19].mxu0 }
 0x1a0   : > { %2847 = vmatmul.mubr.bf16.gmra.mrb[36].mxu0 %v773_v55  ;;  %v2749_v59 = vadd.f32 %v2748_v58, %v2747_v57  ;;  %v707_v60 = vadd.f32 %v2746_v56, %v3858_v10 }
 0x1a2   : > { %v710_v61 = vadd.f32 %v2749_v59, %v3858_v10  ;;  %v745_v62 = vmax.f32 %v707_v60, 0.0 }
 0x1a4   : > { %v2750_v63 = vpop.f32.mrb[20].mxu0  ;;  %v746_v0 = vmax.f32 %v710_v61, 0.0 }
 0x1a5   : > { %v2751_v1 = vpop.f32.mrb[21].mxu0 }
 0x1a6   : > { %v2752_v2 = vadd.f32 %v2751_v1, %v2750_v63  ;;  %v2753_v3 = vpop.f32.mrb[22].mxu0  ;;  %v774_v4 = vpack.c.bf16 %v746_v0, %v745_v62 }
 0x1a7   : > { %v2754_v5 = vpop.f32.mrb[23].mxu0 }
 0x1a8   : > { %v715_v6 = vadd.f32 %v2752_v2, %v3858_v10  ;;  %v2755_v7 = vadd.f32 %v2754_v5, %v2753_v3  ;;  %2850 = vmatprep.mubr.bf16.mxu1 %v774_v4 }
 0x1aa   : > { %v747_v9 = vmax.f32 %v715_v6, 0.0  ;;  %v718_v11 = vadd.f32 %v2755_v7, %v3858_v10 }
 0x1ac   : > { %v748_v12 = vmax.f32 %v718_v11, 0.0  ;;  %v2756_v13 = vpop.f32.mrb[24].mxu0 }
 0x1ad   : > { %v2757_v14 = vpop.f32.mrb[25].mxu0 }
 0x1ae   : > { %v775_v15 = vpack.c.bf16 %v748_v12, %v747_v9  ;;  %v2758_v16 = vadd.f32 %v2757_v14, %v2756_v13  ;;  %v2759_v17 = vpop.f32.mrb[26].mxu0 }
 0x1af   : > { %v2760_v19 = vpop.f32.mrb[27].mxu0 }
 0x1b0   : > { %2851 = vmatmul.mubr.bf16.vlgmr.msra.gmra.mrb[0].mxu1 %v775_v15  ;;  %v723_v20 = vadd.f32 %v2758_v16, %v3858_v10  ;;  %v2761_v21 = vadd.f32 %v2760_v19, %v2759_v17 }
 0x1b1   : > { %2859 = vmatpush3.bf16.msra.mxu1 %v3855_v8 }
 0x1b2   : > { %v749_v22 = vmax.f32 %v723_v20, 0.0  ;;  %v726_v23 = vadd.f32 %v2761_v21, %v3858_v10  ;;  %2860 = vmatprep.subr.bf16.mxu1 %v3113_v18 }
 0x1b4   : > { %v750_v24 = vmax.f32 %v726_v23, 0.0  ;;  %v2762_v25 = vpop.f32.mrb[28].mxu0 }
 0x1b5   : > { %v2763_v26 = vpop.f32.mrb[29].mxu0  ;;  %2861 = vmatpush3.bf16.msra.mxu1 %v3113_v18 }
 0x1b6   : > { %v2764_v27 = vadd.f32 %v2763_v26, %v2762_v25  ;;  %v2765_v28 = vpop.f32.mrb[30].mxu0  ;;  %v776_v29 = vpack.c.bf16 %v750_v24, %v749_v22  ;;  %2862 = vmatprep.subr.bf16.mxu1 %v3114_v36 }
 0x1b7   : > { %v2766_v30 = vpop.f32.mrb[31].mxu0 }
 0x1b8   : > { %v731_v31 = vadd.f32 %v2764_v27, %v3858_v10  ;;  %v2767_v32 = vadd.f32 %v2766_v30, %v2765_v28  ;;  %2854 = vmatprep.mubr.bf16.mxu1 %v776_v29 }
 0x1b9   : > { %2863 = vmatpush3.bf16.msra.mxu1 %v3114_v36 }
 0x1ba   : > { %v751_v33 = vmax.f32 %v731_v31, 0.0  ;;  %v734_v34 = vadd.f32 %v2767_v32, %v3858_v10  ;;  %2864 = vmatprep.subr.bf16.mxu1 %v3115_v37  ;;  %v753_v10 = vld [vmem:[#allocation5 + $0x1] ss:$0 sm:$0xff] }
 0x1bc   : > { %v752_v8 = vmax.f32 %v734_v34, 0.0 }
 0x1bd   : > { %2865 = vmatpush3.bf16.msra.mxu1 %v3115_v37 }
 0x1be   : > { %v777_v35 = vpack.c.bf16 %v752_v8, %v751_v33  ;;  %v939_v33 = vld [vmem:[#allocation5 + $0x2] ss:$0 sm:$0xff] }
 0x1c0   : > { %2855 = vmatmul.mubr.bf16.gmra.mrb[4].mxu1 %v777_v35 }
 0x263   : > { %v2844_v39 = vpop.f32.mrb[32].mxu0 }
 0x264   : > { %v869_v40 = vadd.f32 %v2844_v39, %v753_v10  ;;  %v860_v41 = vpop.f32.mrb[33].mxu0 }
 0x265   : > { %v861_v42 = vadd.f32 %v860_v41, %v753_v10  ;;  %v2845_v43 = vpop.f32.mrb[34].mxu0 }
 0x266   : > { %v872_v44 = vadd.f32 %v2845_v43, %v753_v10  ;;  %v863_v45 = vpop.f32.mrb[35].mxu0  ;;  %v925_v47 = vmax.f32 %v869_v40, 0.0 }
 0x267   : > { %v864_v46 = vadd.f32 %v863_v45, %v753_v10  ;;  %v923_v49 = vmax.f32 %v861_v42, 0.0 }
 0x268   : > { %v926_v48 = vmax.f32 %v872_v44, 0.0 }
 0x269   : > { %v924_v50 = vmax.f32 %v864_v46, 0.0 }
 0x26a   : > { %v949_v51 = vpack.c.bf16 %v926_v48, %v925_v47 }
 0x26b   : > { %v948_v52 = vpack.c.bf16 %v924_v50, %v923_v49 }
 0x26d   : > { %2866 = vmatprep.mubr.msk.bf16.mxu1 %vm980_vm0, %v948_v52 }
 0x26e   : > { %2867 = vmatmul.mubr.msk.bf16.vlgmr.msra.gmra.mrb[8].mxu1 %vm980_vm0, %v949_v51 }
 0x273   : > { %v2848_v53 = vpop.f32.mrb[36].mxu0 }
 0x274   : > { %v885_v54 = vadd.f32 %v2848_v53, %v753_v10  ;;  %v876_v55 = vpop.f32.mrb[37].mxu0 }
 0x275   : > { %v877_v56 = vadd.f32 %v876_v55, %v753_v10  ;;  %v2849_v57 = vpop.f32.mrb[38].mxu0 }
 0x276   : > { %v929_v58 = vmax.f32 %v885_v54, 0.0  ;;  %v888_v59 = vadd.f32 %v2849_v57, %v753_v10  ;;  %v879_v60 = vpop.f32.mrb[39].mxu0 }
 0x277   : > { %v927_v61 = vmax.f32 %v877_v56, 0.0  ;;  %v880_v62 = vadd.f32 %v879_v60, %v753_v10 }
 0x278   : > { %v930_v63 = vmax.f32 %v888_v59, 0.0 }
 0x279   : > { %v928_v0 = vmax.f32 %v880_v62, 0.0 }
 0x27a   : > { %v951_v1 = vpack.c.bf16 %v930_v63, %v929_v58 }
 0x27b   : > { %v950_v2 = vpack.c.bf16 %v928_v0, %v927_v61 }
 0x27d   : > { %2870 = vmatprep.mubr.msk.bf16.mxu1 %vm980_vm0, %v950_v2 }
 0x27e   : > { %2871 = vmatmul.mubr.msk.bf16.gmra.mrb[12].mxu1 %vm980_vm0, %v951_v1 }
 0x283   : > { %v2852_v3 = vpop.f32.mrb[0].mxu1 }
 0x284   : > { %v901_v4 = vadd.f32 %v2852_v3, %v753_v10  ;;  %v892_v5 = vpop.f32.mrb[1].mxu1 }
 0x285   : > { %v893_v6 = vadd.f32 %v892_v5, %v753_v10  ;;  %v2853_v7 = vpop.f32.mrb[2].mxu1 }
 0x286   : > { %v933_v9 = vmax.f32 %v901_v4, 0.0  ;;  %v904_v11 = vadd.f32 %v2853_v7, %v753_v10  ;;  %v895_v12 = vpop.f32.mrb[3].mxu1 }
 0x287   : > { %v931_v13 = vmax.f32 %v893_v6, 0.0  ;;  %v896_v14 = vadd.f32 %v895_v12, %v753_v10 }
 0x288   : > { %v934_v15 = vmax.f32 %v904_v11, 0.0 }
 0x289   : > { %v932_v16 = vmax.f32 %v896_v14, 0.0 }
 0x28a   : > { %v953_v17 = vpack.c.bf16 %v934_v15, %v933_v9 }
 0x28b   : > { %v952_v18 = vpack.c.bf16 %v932_v16, %v931_v13 }
 0x28d   : > { %2874 = vmatprep.mubr.msk.bf16.mxu1 %vm980_vm0, %v952_v18 }
 0x28e   : > { %2875 = vmatmul.mubr.msk.bf16.gmra.mrb[16].mxu1 %vm980_vm0, %v953_v17 }
 0x293   : > { %v2856_v19 = vpop.f32.mrb[4].mxu1 }
 0x294   : > { %v917_v20 = vadd.f32 %v2856_v19, %v753_v10  ;;  %v908_v21 = vpop.f32.mrb[5].mxu1 }
 0x295   : > { %v909_v22 = vadd.f32 %v908_v21, %v753_v10  ;;  %v2857_v23 = vpop.f32.mrb[6].mxu1 }
 0x296   : > { %v937_v24 = vmax.f32 %v917_v20, 0.0  ;;  %v920_v25 = vadd.f32 %v2857_v23, %v753_v10  ;;  %v911_v26 = vpop.f32.mrb[7].mxu1 }
 0x297   : > { %v935_v27 = vmax.f32 %v909_v22, 0.0  ;;  %v912_v28 = vadd.f32 %v911_v26, %v753_v10  ;;  %v3472_v26 = vmov 2  }
 0x298   : > { %v938_v29 = vmax.f32 %v920_v25, 0.0  ;;  %3046 = vset.pattern.permute.xlu1 %v3472_v26 }
 0x299   : > { %v936_v30 = vmax.f32 %v912_v28, 0.0  ;;  %v3908_v28 = vld [vmem:[#allocation5 + $0x3] ss:$0 sm:$0xff] }
 0x29a   : > { %v955_v31 = vpack.c.bf16 %v938_v29, %v937_v24 }
 0x29b   : > { %v954_v32 = vpack.c.bf16 %v936_v30, %v935_v27  ;;  %v3473_v27 = vmov 0  }
 0x29c   : > { %3044 = vset.pattern.permute.xlu0 %v3473_v27 }
 0x29d   : > { %2878 = vmatprep.mubr.msk.bf16.mxu1 %vm980_vm0, %v954_v32 }
 0x29e   : > { %2879 = vmatmul.mubr.msk.bf16.gmra.mrb[20].mxu1 %vm980_vm0, %v955_v31 }
 0x341   : > { %v2868_v34 = vpop.f32.mrb[8].mxu1 }
 0x342   : > { %v1048_v8 = vadd.f32 %v2868_v34, %v939_v33  ;;  %v1039_v35 = vpop.f32.mrb[9].mxu1 }
 0x343   : > { %v1040_v36 = vadd.f32 %v1039_v35, %v939_v33  ;;  %v2869_v37 = vpop.f32.mrb[10].mxu1 }
 0x344   : > { %v1051_v38 = vadd.f32 %v2869_v37, %v939_v33  ;;  %v1042_v39 = vpop.f32.mrb[11].mxu1  ;;  %v1104_v41 = vmax.f32 %v1048_v8, 0.0 }
 0x345   : > { %v1043_v40 = vadd.f32 %v1042_v39, %v939_v33  ;;  %v1102_v10 = vmax.f32 %v1040_v36, 0.0  ;;  %v3474_v36 = vmov 1  }
 0x346   : > { %v1105_v42 = vmax.f32 %v1051_v38, 0.0 }
 0x347   : > { %v1103_v43 = vmax.f32 %v1043_v40, 0.0 }
 0x348   : > { %v1122_v44 = vpack.c.bf16 %v1105_v42, %v1104_v41 }
 0x349   : > { %v1121_v45 = vpack.c.bf16 %v1103_v43, %v1102_v10 }
 0x34b   : > { %2884 = vmatprep.mubr.msk.bf16.mxu0 %vm1135_vm1, %v1121_v45 }
 0x34c   : > { %2885 = vmatmul.mubr.msk.bf16.vlgmr.msra.gmra.mrb[40].mxu0 %vm1135_vm1, %v1122_v44 }
 0x351   : > { %v2872_v46 = vpop.f32.mrb[12].mxu1 }
 0x352   : > { %v1064_v47 = vadd.f32 %v2872_v46, %v939_v33  ;;  %v1055_v48 = vpop.f32.mrb[13].mxu1 }
 0x353   : > { %v1056_v49 = vadd.f32 %v1055_v48, %v939_v33  ;;  %v2873_v50 = vpop.f32.mrb[14].mxu1 }
 0x354   : > { %v1108_v51 = vmax.f32 %v1064_v47, 0.0  ;;  %v1067_v52 = vadd.f32 %v2873_v50, %v939_v33  ;;  %v1058_v53 = vpop.f32.mrb[15].mxu1 }
 0x355   : > { %v1106_v54 = vmax.f32 %v1056_v49, 0.0  ;;  %v1059_v55 = vadd.f32 %v1058_v53, %v939_v33 }
 0x356   : > { %v1109_v56 = vmax.f32 %v1067_v52, 0.0  ;;  %v3117_v52 = vld [vmem:[%s4307_s7] sm:$0xff]  }
 0x357   : > { %v1107_v57 = vmax.f32 %v1059_v55, 0.0  ;;  %2900 = vmatprep.subr.bf16.mxu1 %v3117_v52 }
 0x358   : > { %v1124_v58 = vpack.c.bf16 %v1109_v56, %v1108_v51  ;;  %2901 = vmatpush3.bf16.msra.mxu1 %v3117_v52 }
 0x359   : > { %v1123_v59 = vpack.c.bf16 %v1107_v57, %v1106_v54 }
 0x35b   : > { %2888 = vmatprep.mubr.msk.bf16.mxu0 %vm1135_vm1, %v1123_v59 }
 0x35c   : > { %2889 = vmatmul.mubr.msk.bf16.gmra.mrb[44].mxu0 %vm1135_vm1, %v1124_v58 }
 0x361   : > { %v2876_v60 = vpop.f32.mrb[16].mxu1 }
 0x362   : > { %v1080_v61 = vadd.f32 %v2876_v60, %v939_v33  ;;  %v1071_v62 = vpop.f32.mrb[17].mxu1 }
 0x363   : > { %v1072_v63 = vadd.f32 %v1071_v62, %v939_v33  ;;  %v2877_v0 = vpop.f32.mrb[18].mxu1 }
 0x364   : > { %v1112_v1 = vmax.f32 %v1080_v61, 0.0  ;;  %v1083_v2 = vadd.f32 %v2877_v0, %v939_v33  ;;  %v1074_v3 = vpop.f32.mrb[19].mxu1  ;;  %v1356_v0 = vlaneseq }
 0x365   : > { %v1110_v4 = vmax.f32 %v1072_v63, 0.0  ;;  %v1075_v5 = vadd.f32 %v1074_v3, %v939_v33 }
 0x366   : > { %v1113_v6 = vmax.f32 %v1083_v2, 0.0  ;;  %v4038_v3 = vshrl.u32 %v1356_v0, 7 }
 0x367   : > { %v1111_v7 = vmax.f32 %v1075_v5, 0.0 }
 0x368   : > { %v1126_v9 = vpack.c.bf16 %v1113_v6, %v1112_v1  ;;  %v1458_v6 = vsub.s32 1, %v4038_v3 }
 0x369   : > { %v1125_v11 = vpack.c.bf16 %v1111_v7, %v1110_v4  ;;  %v1274_v4 = vld [vmem:[#allocation7] sm:$0x3] }
 0x36a   : > { %v1275_v7 = vunpack.c.l.bf16 %v1274_v4 }
 0x36b   : > { %2892 = vmatprep.mubr.msk.bf16.mxu0 %vm1135_vm1, %v1125_v11 }
 0x36c   : > { %2893 = vmatmul.mubr.msk.bf16.gmra.mrb[48].mxu0 %vm1135_vm1, %v1126_v9  ;;  %v1358_v9 = vsub.s32 0, %v4038_v3 }
 0x371   : > { %v2880_v12 = vpop.f32.mrb[20].mxu1 }
 0x372   : > { %v1096_v13 = vadd.f32 %v2880_v12, %v939_v33  ;;  %v1087_v14 = vpop.f32.mrb[21].mxu1  ;;  %v1558_v12 = vsub.s32 2, %v4038_v3 }
 0x373   : > { %v1088_v15 = vadd.f32 %v1087_v14, %v939_v33  ;;  %v2881_v16 = vpop.f32.mrb[22].mxu1 }
 0x374   : > { %v1116_v17 = vmax.f32 %v1096_v13, 0.0  ;;  %v1099_v18 = vadd.f32 %v2881_v16, %v939_v33  ;;  %v1090_v19 = vpop.f32.mrb[23].mxu1  ;;  %v4045_v13 = vrot.slane %v1275_v7, %v1458_v6  ;;  %v3118_v16 = vld [vmem:[%s4308_s8] sm:$0xff]  }
 0x375   : > { %v1114_v20 = vmax.f32 %v1088_v15, 0.0  ;;  %v1091_v21 = vadd.f32 %v1090_v19, %v939_v33  ;;  %v4049_v15 = vrot.slane %v1275_v7, %v1358_v9  ;;  %2918 = vmatprep.subr.bf16.mxu0 %v3118_v16  ;;  %v4058_v19 = vrot.slane %v1275_v7, %v1558_v12 }
 0x376   : > { %v1117_v22 = vmax.f32 %v1099_v18, 0.0  ;;  %2919 = vmatpush3.bf16.msra.mxu0 %v3118_v16 }
 0x377   : > { %v1115_v23 = vmax.f32 %v1091_v21, 0.0 }
 0x378   : > { %v1128_v24 = vpack.c.bf16 %v1117_v22, %v1116_v17  ;;  %v3119_v17 = vld [vmem:[%s4308_s8 + $0x8] sm:$0xff]  }
 0x379   : > { %v1127_v25 = vpack.c.bf16 %v1115_v23, %v1114_v20  ;;  %2920 = vmatprep.subr.bf16.mxu0 %v3119_v17 }
 0x37a   : > { %2921 = vmatpush3.bf16.msra.mxu0 %v3119_v17 }
 0x37b   : > { %2896 = vmatprep.mubr.msk.bf16.mxu0 %vm1135_vm1, %v1127_v25 }
 0x37c   : > { %2897 = vmatmul.mubr.msk.bf16.gmra.mrb[52].mxu0 %vm1135_vm1, %v1128_v24 }
 0x41f   : > { %v2886_v29 = vpop.f32.mrb[40].mxu0 }
 0x420   : > { %v1203_v30 = vadd.f32 %v2886_v29, %v3908_v28  ;;  %v1194_v31 = vpop.f32.mrb[41].mxu0 }
 0x421   : > { %v1195_v32 = vadd.f32 %v1194_v31, %v3908_v28  ;;  %v2887_v33 = vpop.f32.mrb[42].mxu0 }
 0x422   : > { %1260 = vst.msk [vmem:[%s3913_s25 + $0x10] sm:$0xff] %vm1257_vm2, %v1203_v30  ;;  %v1206_v34 = vadd.f32 %v2887_v33, %v3908_v28  ;;  %1501 = vperm.xlu1 %3046, %v1203_v30   ;;  %1288 = vperm.xlu0 %3044, %v1203_v30   ;;  %v1197_v8 = vpop.f32.mrb[43].mxu0 }
 0x423   : > { %1258 = vst.msk [vmem:[%s3913_s25] sm:$0xff] %vm1257_vm2, %v1195_v32  ;;  %v1198_v35 = vadd.f32 %v1197_v8, %v3908_v28 }
 0x424   : > { %1261 = vst.msk [vmem:[%s3913_s25 + $0x18] sm:$0xff] %vm1257_vm2, %v1206_v34 }
 0x425   : > { %1259 = vst.msk [vmem:[%s3913_s25 + $0x8] sm:$0xff] %vm1257_vm2, %v1198_v35 }
 0x426   : > { %3048 = vset.pattern.permute.xlu1 %v3474_v36  ;;  %3045 = vset.pattern.permute.xlu0 %v3474_v36 }
 0x427   : > { %1401 = vperm.xlu0 %3045, %v1203_v30   ;;  %1393 = vperm.xlu1 %3048, %v1195_v32  }
 0x42b   : > { %3047 = vset.pattern.permute.xlu0 %v3473_v27  ;;  %3049 = vset.pattern.permute.xlu1 %v3472_v26 }
 0x42c   : > { %1493 = vperm.xlu1 %3049, %v1195_v32   ;;  %1278 = vperm.xlu0 %3047, %v1195_v32  }
 0x42f   : > { %v2890_v37 = vpop.f32.mrb[44].mxu0 }
 0x430   : > { %3050 = vset.pattern.permute.xlu1 %v3473_v27  ;;  %1283 = vperm.xlu0 %3047, %v1198_v35   ;;  %v1219_v38 = vadd.f32 %v2890_v37, %v3908_v28  ;;  %v1210_v39 = vpop.f32.mrb[45].mxu0 }
 0x431   : > { %1293 = vperm.xlu1 %3050, %v1206_v34   ;;  %v1211_v40 = vadd.f32 %v1210_v39, %v3908_v28  ;;  %v2891_v41 = vpop.f32.mrb[46].mxu0 }
 0x432   : > { %1264 = vst.msk [vmem:[%s3913_s25 + $0x30] sm:$0xff] %vm1257_vm2, %v1219_v38  ;;  %v1222_v42 = vadd.f32 %v2891_v41, %v3908_v28  ;;  %v1213_v10 = vpop.f32.mrb[47].mxu0 }
 0x433   : > { %1262 = vst.msk [vmem:[%s3913_s25 + $0x20] sm:$0xff] %vm1257_vm2, %v1211_v40  ;;  %v3940_v43 = vadd.f32 %v1213_v10, %v3908_v28 }
 0x434   : > { %3054 = vset.pattern.permute.xlu0 %v3472_v26  ;;  %1265 = vst.msk [vmem:[%s3913_s25 + $0x38] sm:$0xff] %vm1257_vm2, %v1222_v42 }
 0x435   : > { %3051 = vset.pattern.permute.xlu1 %v3474_v36  ;;  %1497 = vperm.xlu0 %3054, %v1198_v35   ;;  %1263 = vst.msk [vmem:[%s3913_s25 + $0x28] sm:$0xff] %vm1257_vm2, %v3940_v43 }
 0x436   : > { %1405 = vperm.xlu1 %3051, %v1206_v34  }
 0x439   : > { %3056 = vset.pattern.permute.xlu0 %v3474_v36 }
 0x43a   : > { %3052 = vset.pattern.permute.xlu1 %v3472_v26  ;;  %1417 = vperm.xlu0 %3056, %v1219_v38  }
 0x43b   : > { %1505 = vperm.xlu1 %3052, %v1206_v34  }
 0x43e   : > { %3058 = vset.pattern.permute.xlu0 %v3473_v27 }
 0x43f   : > { %3053 = vset.pattern.permute.xlu1 %v3474_v36  ;;  %1298 = vperm.xlu0 %3058, %v1211_v40   ;;  %v2894_v44 = vpop.f32.mrb[48].mxu0 }
 0x440   : > { %1397 = vperm.xlu1 %3053, %v1198_v35   ;;  %v1235_v45 = vadd.f32 %v2894_v44, %v3908_v28  ;;  %v1226_v46 = vpop.f32.mrb[49].mxu0 }
 0x441   : > { %v3955_v47 = vadd.f32 %v1226_v46, %v3908_v28  ;;  %v2895_v48 = vpop.f32.mrb[50].mxu0 }
 0x442   : > { %1268 = vst.msk [vmem:[%s3913_s25 + $0x50] sm:$0xff] %vm1257_vm2, %v1235_v45  ;;  %v3960_v49 = vadd.f32 %v2895_v48, %v3908_v28  ;;  %v1229_v50 = vpop.f32.mrb[51].mxu0 }
 0x443   : > { %3060 = vset.pattern.permute.xlu0 %v3472_v26  ;;  %1266 = vst.msk [vmem:[%s3913_s25 + $0x40] sm:$0xff] %vm1257_vm2, %v3955_v47  ;;  %v3967_v51 = vadd.f32 %v1229_v50, %v3908_v28 }
 0x444   : > { %3055 = vset.pattern.permute.xlu1 %v3473_v27  ;;  %1509 = vperm.xlu0 %3060, %v1211_v40   ;;  %1269 = vst.msk [vmem:[%s3913_s25 + $0x58] sm:$0xff] %vm1257_vm2, %v3960_v49 }
 0x445   : > { %1308 = vperm.xlu1 %3055, %v1219_v38   ;;  %1267 = vst.msk [vmem:[%s3913_s25 + $0x48] sm:$0xff] %vm1257_vm2, %v3967_v51 }
 0x448   : > { %1521 = vperm.xlu0 %3060, %v1222_v42  }
 0x449   : > { %3057 = vset.pattern.permute.xlu1 %v3472_v26 }
 0x44a   : > { %1517 = vperm.xlu1 %3057, %v1219_v38  }
 0x44c   : > { %3064 = vset.pattern.permute.xlu0 %v3474_v36 }
 0x44d   : > { %1413 = vperm.xlu0 %3064, %v3940_v43  }
 0x44e   : > { %3059 = vset.pattern.permute.xlu1 %v3474_v36 }
 0x44f   : > { %1409 = vperm.xlu1 %3059, %v1211_v40   ;;  %v2898_v53 = vpop.f32.mrb[52].mxu0  ;;  %v4070_v40 = vld [vmem:[#allocation5 + $0x4] ss:$0 sm:$0xff] }
 0x450   : > { %v3984_v54 = vadd.f32 %v2898_v53, %v3908_v28  ;;  %v1242_v55 = vpop.f32.mrb[53].mxu0 }
 0x451   : > { %3066 = vset.pattern.permute.xlu0 %v3473_v27  ;;  %v1243_v56 = vadd.f32 %v1242_v55, %v3908_v28  ;;  %v2899_v57 = vpop.f32.mrb[54].mxu0 }
 0x452   : > { %1328 = vperm.xlu0 %3066, %v1235_v45   ;;  %1272 = vst.msk [vmem:[%s3913_s25 + $0x70] sm:$0xff] %vm1257_vm2, %v3984_v54  ;;  %v1254_v58 = vadd.f32 %v2899_v57, %v3908_v28  ;;  %v1245_v59 = vpop.f32.mrb[55].mxu0 }
 0x453   : > { %3061 = vset.pattern.permute.xlu1 %v3473_v27  ;;  %1270 = vst.msk [vmem:[%s3913_s25 + $0x60] sm:$0xff] %vm1257_vm2, %v1243_v56  ;;  %v1246_v60 = vadd.f32 %v1245_v59, %v3908_v28 }
 0x454   : > { %1313 = vperm.xlu1 %3061, %v1222_v42   ;;  %1273 = vst.msk [vmem:[%s3913_s25 + $0x78] sm:$0xff] %vm1257_vm2, %v1254_v58 }
 0x455   : > { %1271 = vst.msk [vmem:[%s3913_s25 + $0x68] sm:$0xff] %vm1257_vm2, %v1246_v60  ;;  %s4191_s25 = scalar_lea.vmem [#allocation10], %s2573_s30  ;;  %s2703_s30 = sshll.u32 %s3559_s21, 12 }
 0x456   : > { %3067 = vset.pattern.permute.xlu0 %v3474_v36  ;;  %s2431_s27 = sshll.u32 %s4191_s25, 4  ;;  %s4251_s22 = scalar_lea.hbm %s4335_s23, %s2703_s30  ;;  %s4253_s27 = int_to_ptr.vmem [resolvable:$true] %s2431_s27 }
 0x457   : > { %1433 = vperm.xlu0 %3067, %v1235_v45   ;;  %s2412_s21 = scalar_lea.sflag [#allocation4], %s3728_s28  ;;  %s3388_s29 = scalar_lea.vmem %s4253_s27, 4096 }
 0x458   : > { %3062 = vset.pattern.permute.xlu1 %v3474_v36  ;;  %p3389_p4 = scmp.ne.s32.totalorder %s4253_s27, %s3388_s29  ;;  %p3395_p7 = scmp.lt.s32.totalorder %s4253_s27, %s3393_s14 }
 0x459   : > { %1421 = vperm.xlu1 %3062, %v1222_v42   ;;  %p3396_p10 = scmp.lt.s32.totalorder %s3394_s13, %s3388_s29 }
 0x45a   : > { %p3390_p8 = pnand %p3389_p4, %p3680_p6 }
 0x45b   : > { %3074 = vset.pattern.permute.xlu0 %v3473_v27  ;;  %p3397_p13 = por %p3396_p10, %p3395_p7 }
 0x45c   : > { %1323 = vperm.xlu0 %3074, %v3967_v51   ;;  %p3391_p3 = pneg %p3390_p8 }
 0x45d   : > { %3063 = vset.pattern.permute.xlu1 %v3473_v27 }
 0x45e   : > { %1303 = vperm.xlu1 %3063, %v3940_v43   ;;  %p3398_p0 = pnand %p3397_p13, %p3391_p3 }
 0x460   : > { %3076 = vset.pattern.permute.xlu0 %v3472_v26 }
 0x461   : > { %1529 = vperm.xlu0 %3076, %v3967_v51  }
 0x462   : > { %3065 = vset.pattern.permute.xlu1 %v3472_v26 }
 0x463   : > { %1513 = vperm.xlu1 %3065, %v3940_v43  }
 0x465   : > { %3078 = vset.pattern.permute.xlu0 %v3474_v36 }
 0x466   : > { %1449 = vperm.xlu0 %3078, %v3984_v54  }
 0x467   : > { %1533 = vperm.xlu1 %3065, %v1235_v45  }
 0x46a   : > { %3079 = vset.pattern.permute.xlu0 %v3473_v27 }
 0x46b   : > { %3068 = vset.pattern.permute.xlu1 %v3473_v27  ;;  %1338 = vperm.xlu0 %3079, %v1243_v56  }
 0x46c   : > { %1318 = vperm.xlu1 %3068, %v3955_v47  }
 0x46f   : > { %3081 = vset.pattern.permute.xlu0 %v3472_v26 }
 0x470   : > { %3069 = vset.pattern.permute.xlu1 %v3474_v36  ;;  %1541 = vperm.xlu0 %3081, %v1243_v56  }
 0x471   : > { %1425 = vperm.xlu1 %3069, %v3955_v47  }
 0x474   : > { %3085 = vset.pattern.permute.xlu0 %v3474_v36 }
 0x475   : > { %3070 = vset.pattern.permute.xlu1 %v3472_v26  ;;  %1445 = vperm.xlu0 %3085, %v1246_v60  }
 0x476   : > { %1525 = vperm.xlu1 %3070, %v3955_v47  }
 0x479   : > { %3087 = vset.pattern.permute.xlu0 %v3472_v26 }
 0x47a   : > { %3071 = vset.pattern.permute.xlu1 %v3473_v27  ;;  %1553 = vperm.xlu0 %3087, %v1254_v58  }
 0x47b   : > { %1333 = vperm.xlu1 %3071, %v3960_v49  }
 0x47f   : > { %3072 = vset.pattern.permute.xlu1 %v3474_v36 }
 0x480   : > { %1437 = vperm.xlu1 %3072, %v3960_v49  }
 0x484   : > { %3073 = vset.pattern.permute.xlu1 %v3472_v26 }
 0x485   : > { %1537 = vperm.xlu1 %3073, %v3960_v49  }
 0x489   : > { %3075 = vset.pattern.permute.xlu1 %v3474_v36 }
 0x48a   : > { %1429 = vperm.xlu1 %3075, %v3967_v51  }
 0x48e   : > { %3077 = vset.pattern.permute.xlu1 %v3473_v27 }
 0x48f   : > { %1348 = vperm.xlu1 %3077, %v3984_v54  }
 0x493   : > { %3080 = vset.pattern.permute.xlu1 %v3474_v36 }
 0x494   : > { %1441 = vperm.xlu1 %3080, %v1243_v56  }
 0x498   : > { %3082 = vset.pattern.permute.xlu1 %v3473_v27 }
 0x499   : > { %1353 = vperm.xlu1 %3082, %v1254_v58  }
 0x49d   : > { %3083 = vset.pattern.permute.xlu1 %v3474_v36 }
 0x49e   : > { %1453 = vperm.xlu1 %3083, %v1254_v58  }
 0x4a1   : > { %v1502_v61 = vpop.permute.xlu1 %1501  ;;  %v1289_v63 = vpop.permute.xlu0 %1288 }
 0x4a2   : > { %3084 = vset.pattern.permute.xlu1 %v3473_v27  ;;  %v1362_v25 = vmul.f32 %v4049_v15, %v1289_v63  ;;  %v1562_v33 = vmul.f32 %v4058_v19, %v1502_v61 }
 0x4a3   : > { %1343 = vperm.xlu1 %3084, %v1246_v60  }
 0x4a6   : > { %v1394_v62 = vpop.permute.xlu1 %1393  ;;  %v1402_v2 = vpop.permute.xlu0 %1401 }
 0x4a7   : > { %3086 = vset.pattern.permute.xlu1 %v3472_v26  ;;  %v1462_v20 = vmul.f32 %v4045_v13, %v1402_v2  ;;  %v1460_v23 = vmul.f32 %v4045_v13, %v1394_v62 }
 0x4a8   : > { %1545 = vperm.xlu1 %3086, %v1246_v60  }
 0x4a9   : > { %v1478_v30 = vadd.f32 %v1462_v20, %v1362_v25 }
 0x4ab   : > { %v1494_v1 = vpop.permute.xlu1 %1493  ;;  %v1279_v11 = vpop.permute.xlu0 %1278  ;;  %v1578_v39 = vadd.f32 %v1562_v33, %v1478_v30 }
 0x4ac   : > { %1549 = vperm.xlu1 %3086, %v3984_v54   ;;  %v1360_v18 = vmul.f32 %v4049_v15, %v1279_v11  ;;  %v1560_v32 = vmul.f32 %v4058_v19, %v1494_v1 }
 0x4ad   : > { %v1595_v46 = vadd.f32 %v4070_v40, %v1578_v39 }
 0x4ae   : > { %v1476_v29 = vadd.f32 %v1460_v23, %v1360_v18 }
 0x4af   : > { %v1284_v21 = vpop.permute.xlu0 %1283  ;;  %v1611_v52 = vmax.f32 %v1595_v46, 0.0 }
 0x4b0   : > { %v1294_v5 = vpop.permute.xlu1 %1293  ;;  %v1576_v36 = vadd.f32 %v1560_v32, %v1476_v29  ;;  %v1361_v37 = vmul.f32 %v4049_v15, %v1284_v21 }
 0x4b1   : > { %v1363_v26 = vmul.f32 %v4049_v15, %v1294_v5 }
 0x4b2   : > { %v1593_v43 = vadd.f32 %v4070_v40, %v1576_v36 }
 0x4b4   : > { %v1498_v34 = vpop.permute.xlu0 %1497  ;;  %v1609_v50 = vmax.f32 %v1593_v43, 0.0 }
 0x4b5   : > { %v1406_v14 = vpop.permute.xlu1 %1405  ;;  %v1561_v41 = vmul.f32 %v4058_v19, %v1498_v34 }
 0x4b6   : > { %v1463_v22 = vmul.f32 %v4045_v13, %v1406_v14 }
 0x4b8   : > { %v1479_v31 = vadd.f32 %v1463_v22, %v1363_v26 }
 0x4b9   : > { %v1418_v47 = vpop.permute.xlu0 %1417 }
 0x4ba   : > { %v1506_v24 = vpop.permute.xlu1 %1505  ;;  %v1466_v11 = vmul.f32 %v4045_v13, %v1418_v47 }
 0x4bb   : > { %v1563_v28 = vmul.f32 %v4058_v19, %v1506_v24 }
 0x4bd   : > { %v1579_v8 = vadd.f32 %v1563_v28, %v1479_v31 }
 0x4be   : > { %v1299_v56 = vpop.permute.xlu0 %1298 }
 0x4bf   : > { %v1398_v35 = vpop.permute.xlu1 %1397  ;;  %v1596_v10 = vadd.f32 %v4070_v40, %v1579_v8  ;;  %v1364_v1 = vmul.f32 %v4049_v15, %v1299_v56 }
 0x4c0   : > { %v1461_v38 = vmul.f32 %v4045_v13, %v1398_v35 }
 0x4c1   : > { %v1612_v49 = vmax.f32 %v1596_v10, 0.0 }
 0x4c2   : > { %v1477_v42 = vadd.f32 %v1461_v38, %v1361_v37 }
 0x4c3   : > { %v1629_v55 = vpack.c.bf16 %v1612_v49, %v1611_v52  ;;  %v1510_v58 = vpop.permute.xlu0 %1509 }
 0x4c4   : > { %v1577_v44 = vadd.f32 %v1561_v41, %v1477_v42  ;;  %v1309_v45 = vpop.permute.xlu1 %1308  ;;  %v1564_v17 = vmul.f32 %v4058_v19, %v1510_v58 }
 0x4c5   : > { %v1366_v2 = vmul.f32 %v4049_v15, %v1309_v45 }
 0x4c6   : > { %v1594_v48 = vadd.f32 %v4070_v40, %v1577_v44 }
 0x4c7   : > { %v1522_v60 = vpop.permute.xlu0 %1521  ;;  %v1482_v20 = vadd.f32 %v1466_v11, %v1366_v2 }
 0x4c8   : > { %v1610_v51 = vmax.f32 %v1594_v48, 0.0  ;;  %v1567_v12 = vmul.f32 %v4058_v19, %v1522_v60 }
 0x4c9   : > { %v1518_v53 = vpop.permute.xlu1 %1517 }
 0x4ca   : > { %v1628_v54 = vpack.c.bf16 %v1610_v51, %v1609_v50  ;;  %v1566_v14 = vmul.f32 %v4058_v19, %v1518_v53 }
 0x4cc   : > { %2902 = vmatprep.mubr.msk.bf16.mxu1 %vm1135_vm1, %v1628_v54  ;;  %v1414_v16 = vpop.permute.xlu0 %1413  ;;  %v1582_v24 = vadd.f32 %v1566_v14, %v1482_v20 }
 0x4cd   : > { %2903 = vmatmul.mubr.msk.bf16.vlgmr.msra.gmra.mrb[24].mxu1 %vm1135_vm1, %v1629_v55  ;;  %v1465_v22 = vmul.f32 %v4045_v13, %v1414_v16 }
 0x4ce   : > { %v1410_v57 = vpop.permute.xlu1 %1409  ;;  %v1599_v32 = vadd.f32 %v4070_v40, %v1582_v24 }
 0x4cf   : > { %v1464_v62 = vmul.f32 %v4045_v13, %v1410_v57 }
 0x4d0   : > { %v1615_v37 = vmax.f32 %v1599_v32, 0.0 }
 0x4d1   : > { %v1480_v5 = vadd.f32 %v1464_v62, %v1364_v1  ;;  %v1329_v43 = vpop.permute.xlu0 %1328 }
 0x4d2   : > { %v1370_v51 = vmul.f32 %v4049_v15, %v1329_v43  ;;  %v3121_v43 = vld [vmem:[%s4308_s8 + $0x18] sm:$0xff]  }
 0x4d3   : > { %v1314_v59 = vpop.permute.xlu1 %1313  ;;  %v1580_v23 = vadd.f32 %v1564_v17, %v1480_v5 }
 0x4d4   : > { %v1367_v0 = vmul.f32 %v4049_v15, %v1314_v59 }
 0x4d5   : > { %v1597_v30 = vadd.f32 %v4070_v40, %v1580_v23 }
 0x4d6   : > { %v1434_v45 = vpop.permute.xlu0 %1433 }
 0x4d7   : > { %v1613_v35 = vmax.f32 %v1597_v30, 0.0  ;;  %v1470_v52 = vmul.f32 %v4045_v13, %v1434_v45 }
 0x4d8   : > { %v1422_v61 = vpop.permute.xlu1 %1421 }
 0x4d9   : > { %v1467_v63 = vmul.f32 %v4045_v13, %v1422_v61  ;;  %v1486_v60 = vadd.f32 %v1470_v52, %v1370_v51 }
 0x4db   : > { %v1483_v4 = vadd.f32 %v1467_v63, %v1367_v0  ;;  %v1324_v47 = vpop.permute.xlu0 %1323 }
 0x4dc   : > { %v1369_v0 = vmul.f32 %v4049_v15, %v1324_v47 }
 0x4dd   : > { %v1304_v7 = vpop.permute.xlu1 %1303  ;;  %v1583_v21 = vadd.f32 %v1567_v12, %v1483_v4 }
 0x4de   : > { %v1365_v18 = vmul.f32 %v4049_v15, %v1304_v7 }
 0x4df   : > { %v1600_v29 = vadd.f32 %v4070_v40, %v1583_v21 }
 0x4e0   : > { %v1481_v26 = vadd.f32 %v1465_v22, %v1365_v18  ;;  %v1530_v61 = vpop.permute.xlu0 %1529 }
 0x4e1   : > { %v1616_v8 = vmax.f32 %v1600_v29, 0.0  ;;  %v1569_v5 = vmul.f32 %v4058_v19, %v1530_v61 }
 0x4e2   : > { %v1514_v25 = vpop.permute.xlu1 %1513 }
 0x4e3   : > { %v1565_v28 = vmul.f32 %v4058_v19, %v1514_v25  ;;  %v1631_v41 = vpack.c.bf16 %v1616_v8, %v1615_v37 }
 0x4e5   : > { %v1581_v31 = vadd.f32 %v1565_v28, %v1481_v26  ;;  %v1450_v11 = vpop.permute.xlu0 %1449 }
 0x4e6   : > { %v1534_v33 = vpop.permute.xlu1 %1533  ;;  %v1474_v52 = vmul.f32 %v4045_v13, %v1450_v11  ;;  %v3130_v11 = vld [vmem:[#allocation8 + $0x24] ss:$8 sps:$4 sm:$0xff]  }
 0x4e7   : > { %v1598_v34 = vadd.f32 %v4070_v40, %v1581_v31  ;;  %v1570_v57 = vmul.f32 %v4058_v19, %v1534_v33 }
 0x4e9   : > { %v1614_v36 = vmax.f32 %v1598_v34, 0.0  ;;  %v1586_v4 = vadd.f32 %v1570_v57, %v1486_v60 }
 0x4ea   : > { %v1339_v25 = vpop.permute.xlu0 %1338 }
 0x4eb   : > { %v1630_v38 = vpack.c.bf16 %v1614_v36, %v1613_v35  ;;  %v1319_v39 = vpop.permute.xlu1 %1318  ;;  %v1603_v18 = vadd.f32 %v4070_v40, %v1586_v4  ;;  %v1372_v8 = vmul.f32 %v4049_v15, %v1339_v25  ;;  %v3120_v35 = vld [vmem:[%s4308_s8 + $0x10] sm:$0xff]  }
 0x4ec   : > { %v1368_v55 = vmul.f32 %v4049_v15, %v1319_v39  ;;  %2922 = vmatprep.subr.bf16.mxu0 %v3120_v35  ;;  %v3122_v4 = vld [vmem:[#allocation8] ss:$8 sps:$4 sm:$0xff]  }
 0x4ed   : > { %2906 = vmatprep.mubr.msk.bf16.mxu1 %vm1135_vm1, %v1630_v38  ;;  %v1619_v24 = vmax.f32 %v1603_v18, 0.0  ;;  %2923 = vmatpush3.bf16.msra.mxu0 %v3120_v35  ;;  %v3136_v18 = vld [vmem:[#allocation8 + $0x44] ss:$8 sps:$4 sm:$0xff]  }
 0x4ee   : > { %2907 = vmatmul.mubr.msk.bf16.gmra.mrb[28].mxu1 %vm1135_vm1, %v1631_v41  ;;  %2924 = vmatprep.subr.bf16.mxu0 %v3121_v43 }
 0x4ef   : > { %v1542_v31 = vpop.permute.xlu0 %1541 }
 0x4f0   : > { %v1426_v42 = vpop.permute.xlu1 %1425  ;;  %v1572_v39 = vmul.f32 %v4058_v19, %v1542_v31 }
 0x4f1   : > { %v1468_v49 = vmul.f32 %v4045_v13, %v1426_v42  ;;  %2925 = vmatpush3.bf16.msra.mxu0 %v3121_v43 }
 0x4f3   : > { %v1484_v59 = vadd.f32 %v1468_v49, %v1368_v55 }
 0x4f4   : > { %v1446_v34 = vpop.permute.xlu0 %1445 }
 0x4f5   : > { %v1526_v10 = vpop.permute.xlu1 %1525 }
 0x4f6   : > { %v1568_v56 = vmul.f32 %v4058_v19, %v1526_v10 }
 0x4f8   : > { %v1584_v1 = vadd.f32 %v1568_v56, %v1484_v59 }
 0x4f9   : > { %v1554_v10 = vpop.permute.xlu0 %1553 }
 0x4fa   : > { %v1334_v44 = vpop.permute.xlu1 %1333  ;;  %v1601_v14 = vadd.f32 %v4070_v40, %v1584_v1 }
 0x4fb   : > { %v1371_v53 = vmul.f32 %v4049_v15, %v1334_v44  ;;  %v1473_v44 = vmul.f32 %v4045_v13, %v1446_v34 }
 0x4fc   : > { %v1617_v22 = vmax.f32 %v1601_v14, 0.0  ;;  %v4140_v14 = vld [vmem:[#allocation5 + $0x5] ss:$0 sm:$0xff] }
 0x4ff   : > { %v1438_v46 = vpop.permute.xlu1 %1437 }
 0x500   : > { %v1471_v48 = vmul.f32 %v4045_v13, %v1438_v46 }
 0x502   : > { %v1487_v58 = vadd.f32 %v1471_v48, %v1371_v53  ;;  %v1575_v48 = vmul.f32 %v4058_v19, %v1554_v10 }
 0x504   : > { %v1538_v50 = vpop.permute.xlu1 %1537 }
 0x505   : > { %v1571_v54 = vmul.f32 %v4058_v19, %v1538_v50 }
 0x507   : > { %v1587_v62 = vadd.f32 %v1571_v54, %v1487_v58 }
 0x509   : > { %v1430_v63 = vpop.permute.xlu1 %1429  ;;  %v1604_v12 = vadd.f32 %v4070_v40, %v1587_v62 }
 0x50a   : > { %v1469_v2 = vmul.f32 %v4045_v13, %v1430_v63 }
 0x50b   : > { %v1620_v21 = vmax.f32 %v1604_v12, 0.0  ;;  %v3128_v12 = vld [vmem:[#allocation8 + $0x20] ss:$8 sps:$4 sm:$0xff]  }
 0x50c   : > { %v1485_v7 = vadd.f32 %v1469_v2, %v1369_v0 }
 0x50d   : > { %v1633_v29 = vpack.c.bf16 %v1620_v21, %v1619_v24 }
 0x50e   : > { %v1585_v16 = vadd.f32 %v1569_v5, %v1485_v7  ;;  %v1349_v17 = vpop.permute.xlu1 %1348  ;;  %v3124_v5 = vld [vmem:[#allocation8 + $0x4] ss:$8 sps:$4 sm:$0xff]   ;;  %v3125_v7 = vld [vmem:[#allocation8 + $0x10] ss:$8 sps:$4 sm:$0xff]  }
 0x50f   : > { %v1374_v49 = vmul.f32 %v4049_v15, %v1349_v17  ;;  %2074 = vmatprep.subr.bf16.mxu1 %v3124_v5 }
 0x510   : > { %v1602_v20 = vadd.f32 %v4070_v40, %v1585_v16  ;;  %2075 = vmatpush1.bf16.msra.mxu1 %v3122_v4  ;;  %v3131_v16 = vld [vmem:[#allocation8 + $0x30] ss:$8 sps:$4 sm:$0xff]  }
 0x511   : > { %v1490_v57 = vadd.f32 %v1474_v52, %v1374_v49 }
 0x512   : > { %v1618_v23 = vmax.f32 %v1602_v20, 0.0 }
 0x513   : > { %v1442_v26 = vpop.permute.xlu1 %1441 }
 0x514   : > { %v1632_v28 = vpack.c.bf16 %v1618_v23, %v1617_v22  ;;  %v1472_v33 = vmul.f32 %v4045_v13, %v1442_v26  ;;  %v3134_v26 = vld [vmem:[#allocation8 + $0x40] ss:$8 sps:$4 sm:$0xff]  }
 0x516   : > { %2910 = vmatprep.mubr.msk.bf16.mxu1 %vm1135_vm1, %v1632_v28  ;;  %v1488_v36 = vadd.f32 %v1472_v33, %v1372_v8  ;;  %v3137_v8 = vld [vmem:[#allocation8 + $0x50] ss:$8 sps:$4 sm:$0xff]  }
 0x517   : > { %2911 = vmatmul.mubr.msk.bf16.gmra.mrb[32].mxu1 %vm1135_vm1, %v1633_v29  ;;  %v3139_v29 = vld [vmem:[#allocation8 + $0x54] ss:$8 sps:$4 sm:$0xff]  }
 0x518   : > { %v1354_v30 = vpop.permute.xlu1 %1353  ;;  %v1588_v45 = vadd.f32 %v1572_v39, %v1488_v36 }
 0x519   : > { %v1375_v41 = vmul.f32 %v4049_v15, %v1354_v30 }
 0x51a   : > { %v1605_v53 = vadd.f32 %v4070_v40, %v1588_v45 }
 0x51c   : > { %v1621_v60 = vmax.f32 %v1605_v53, 0.0 }
 0x51d   : > { %v1454_v32 = vpop.permute.xlu1 %1453 }
 0x51e   : > { %v1475_v37 = vmul.f32 %v4045_v13, %v1454_v32 }
 0x520   : > { %v1491_v46 = vadd.f32 %v1475_v37, %v1375_v41 }
 0x522   : > { %v1344_v38 = vpop.permute.xlu1 %1343  ;;  %v1591_v54 = vadd.f32 %v1575_v48, %v1491_v46 }
 0x523   : > { %v1373_v42 = vmul.f32 %v4049_v15, %v1344_v38 }
 0x524   : > { %v1608_v61 = vadd.f32 %v4070_v40, %v1591_v54 }
 0x525   : > { %v1489_v50 = vadd.f32 %v1473_v44, %v1373_v42 }
 0x526   : > { %v1624_v1 = vmax.f32 %v1608_v61, 0.0 }
 0x527   : > { %v1546_v47 = vpop.permute.xlu1 %1545 }
 0x528   : > { %v1573_v51 = vmul.f32 %v4058_v19, %v1546_v47 }
 0x52a   : > { %v1589_v55 = vadd.f32 %v1573_v51, %v1489_v50 }
 0x52b   : > { %v1550_v56 = vpop.permute.xlu1 %1549 }
 0x52c   : > { %v1606_v58 = vadd.f32 %v4070_v40, %v1589_v55  ;;  %v1574_v59 = vmul.f32 %v4058_v19, %v1550_v56  ;;  %v3127_v19 = vld [vmem:[#allocation8 + $0x14] ss:$8 sps:$4 sm:$0xff]  }
 0x52d   : > { %2076 = vmatprep.subr.bf16.mxu1 %v3127_v19 }
 0x52e   : > { %v1622_v15 = vmax.f32 %v1606_v58, 0.0  ;;  %v1590_v62 = vadd.f32 %v1574_v59, %v1490_v57  ;;  %2077 = vmatpush1.bf16.msra.mxu1 %v3125_v7 }
 0x52f   : > { %2078 = vmatprep.subr.bf16.mxu1 %v3130_v11 }
 0x530   : > { %v1634_v63 = vpack.c.bf16 %v1622_v15, %v1621_v60  ;;  %v1607_v0 = vadd.f32 %v4070_v40, %v1590_v62  ;;  %v3133_v40 = vld [vmem:[#allocation8 + $0x34] ss:$8 sps:$4 sm:$0xff]  }
 0x532   : > { %v1623_v13 = vmax.f32 %v1607_v0, 0.0  ;;  %2914 = vmatprep.mubr.msk.bf16.mxu1 %vm1135_vm1, %v1634_v63  ;;  %2079 = vmatpush1.bf16.msra.mxu1 %v3128_v12  ;;  %v3142_v63 = vld [vmem:[#allocation8 + $0x64] ss:$8 sps:$4 sm:$0xff]   ;;  %v3140_v0 = vld [vmem:[#allocation8 + $0x60] ss:$8 sps:$4 sm:$0xff]  }
 0x533   : > { %2080 = vmatprep.subr.bf16.mxu1 %v3133_v40 }
 0x534   : > { %v1635_v2 = vpack.c.bf16 %v1624_v1, %v1623_v13  ;;  %v3145_v1 = vld [vmem:[#allocation8 + $0x74] ss:$8 sps:$4 sm:$0xff]   ;;  %v3143_v13 = vld [vmem:[#allocation8 + $0x70] ss:$8 sps:$4 sm:$0xff]  }
 0x536   : > { %2915 = vmatmul.mubr.msk.bf16.gmra.mrb[36].mxu1 %vm1135_vm1, %v1635_v2 }
 0x537   : > { %2106 = vmatprep.mubr.bf16.mxu1 %v3473_v27  ;;  %2081 = vmatpush1.bf16.msra.mxu1 %v3131_v16 }
 0x538   : > { %2082 = vmatprep.subr.bf16.mxu1 %v3136_v18 }
 0x53b   : > { %2083 = vmatpush1.bf16.msra.mxu1 %v3134_v26 }
 0x53c   : > { %2084 = vmatprep.subr.bf16.mxu1 %v3139_v29 }
 0x53f   : > { %2085 = vmatpush1.bf16.msra.mxu1 %v3137_v8 }
 0x540   : > { %2086 = vmatprep.subr.bf16.mxu1 %v3142_v63 }
 0x543   : > { %2087 = vmatpush1.bf16.msra.mxu1 %v3140_v0 }
 0x544   : > { %2088 = vmatprep.subr.bf16.mxu1 %v3145_v1 }
 0x547   : > { %2089 = vmatpush1.bf16.msra.mxu1 %v3143_v13 }
 0x5a0   : > { %v2904_v17 = vpop.f32.mrb[24].mxu1 }
 0x5a1   : > { %v1709_v20 = vadd.f32 %v2904_v17, %v4140_v14  ;;  %v1700_v21 = vpop.f32.mrb[25].mxu1 }
 0x5a2   : > { %v1701_v22 = vadd.f32 %v1700_v21, %v4140_v14  ;;  %v2905_v23 = vpop.f32.mrb[26].mxu1 }
 0x5a3   : > { %v1712_v24 = vadd.f32 %v2905_v23, %v4140_v14  ;;  %v1703_v25 = vpop.f32.mrb[27].mxu1  ;;  %v1765_v30 = vmax.f32 %v1709_v20, 0.0  ;;  %v1779_v23 = vld [vmem:[#allocation5 + $0x6] ss:$0 sm:$0xff] }
 0x5a4   : > { %v1704_v28 = vadd.f32 %v1703_v25, %v4140_v14  ;;  %v1763_v32 = vmax.f32 %v1701_v22, 0.0 }
 0x5a5   : > { %v1766_v31 = vmax.f32 %v1712_v24, 0.0 }
 0x5a6   : > { %v1764_v33 = vmax.f32 %v1704_v28, 0.0 }
 0x5a7   : > { %v1789_v34 = vpack.c.bf16 %v1766_v31, %v1765_v30 }
 0x5a8   : > { %v1788_v35 = vpack.c.bf16 %v1764_v33, %v1763_v32 }
 0x5aa   : > { %2926 = vmatprep.mubr.msk.bf16.mxu0 %vm980_vm0, %v1788_v35 }
 0x5ab   : > { %2927 = vmatmul.mubr.msk.bf16.vlgmr.msra.gmra.mrb[56].mxu0 %vm980_vm0, %v1789_v34 }
 0x5c1   : > { %v2908_v36 = vpop.f32.mrb[28].mxu1 }
 0x5c2   : > { %v1725_v37 = vadd.f32 %v2908_v36, %v4140_v14  ;;  %v1716_v38 = vpop.f32.mrb[29].mxu1 }
 0x5c3   : > { %v1717_v39 = vadd.f32 %v1716_v38, %v4140_v14  ;;  %v2909_v41 = vpop.f32.mrb[30].mxu1 }
 0x5c4   : > { %v1728_v42 = vadd.f32 %v2909_v41, %v4140_v14  ;;  %v1719_v10 = vpop.f32.mrb[31].mxu1  ;;  %v1769_v44 = vmax.f32 %v1725_v37, 0.0 }
 0x5c5   : > { %v1720_v43 = vadd.f32 %v1719_v10, %v4140_v14  ;;  %v1767_v46 = vmax.f32 %v1717_v39, 0.0 }
 0x5c6   : > { %v1770_v45 = vmax.f32 %v1728_v42, 0.0 }
 0x5c7   : > { %v1768_v47 = vmax.f32 %v1720_v43, 0.0 }
 0x5c8   : > { %v1791_v48 = vpack.c.bf16 %v1770_v45, %v1769_v44 }
 0x5c9   : > { %v1790_v49 = vpack.c.bf16 %v1768_v47, %v1767_v46 }
 0x5cb   : > { %2930 = vmatprep.mubr.msk.bf16.mxu0 %vm980_vm0, %v1790_v49 }
 0x5cc   : > { %2931 = vmatmul.mubr.msk.bf16.gmra.mrb[60].mxu0 %vm980_vm0, %v1791_v48 }
 0x5ea   : > { %v2912_v50 = vpop.f32.mrb[32].mxu1 }
 0x5eb   : > { %v1741_v51 = vadd.f32 %v2912_v50, %v4140_v14  ;;  %v1732_v52 = vpop.f32.mrb[33].mxu1 }
 0x5ec   : > { %v1733_v53 = vadd.f32 %v1732_v52, %v4140_v14  ;;  %v2913_v54 = vpop.f32.mrb[34].mxu1 }
 0x5ed   : > { %v1744_v55 = vadd.f32 %v2913_v54, %v4140_v14  ;;  %v1735_v56 = vpop.f32.mrb[35].mxu1  ;;  %v1773_v58 = vmax.f32 %v1741_v51, 0.0 }
 0x5ee   : > { %v1736_v57 = vadd.f32 %v1735_v56, %v4140_v14  ;;  %v1771_v60 = vmax.f32 %v1733_v53, 0.0 }
 0x5ef   : > { %v1774_v59 = vmax.f32 %v1744_v55, 0.0 }
 0x5f0   : > { %v1772_v61 = vmax.f32 %v1736_v57, 0.0 }
 0x5f1   : > { %v1793_v15 = vpack.c.bf16 %v1774_v59, %v1773_v58 }
 0x5f2   : > { %v1792_v62 = vpack.c.bf16 %v1772_v61, %v1771_v60 }
 0x5f4   : > { %2934 = vmatprep.mubr.msk.bf16.mxu0 %vm980_vm0, %v1792_v62 }
 0x5f5   : > { %2935 = vmatmul.mubr.msk.bf16.gmra.mrb[64].mxu0 %vm980_vm0, %v1793_v15 }
 0x609   : > { %v2916_v2 = vpop.f32.mrb[36].mxu1 }
 0x60a   : > { %v1757_v4 = vadd.f32 %v2916_v2, %v4140_v14  ;;  %v1748_v5 = vpop.f32.mrb[37].mxu1 }
 0x60b   : > { %v1749_v19 = vadd.f32 %v1748_v5, %v4140_v14  ;;  %v2917_v7 = vpop.f32.mrb[38].mxu1 }
 0x60c   : > { %v1760_v11 = vadd.f32 %v2917_v7, %v4140_v14  ;;  %v1751_v12 = vpop.f32.mrb[39].mxu1  ;;  %v1777_v16 = vmax.f32 %v1757_v4, 0.0 }
 0x60d   : > { %v1752_v40 = vadd.f32 %v1751_v12, %v4140_v14  ;;  %v1775_v18 = vmax.f32 %v1749_v19, 0.0 }
 0x60e   : > { %v1778_v17 = vmax.f32 %v1760_v11, 0.0 }
 0x60f   : > { %v1776_v20 = vmax.f32 %v1752_v40, 0.0 }
 0x610   : > { %v1795_v21 = vpack.c.bf16 %v1778_v17, %v1777_v16 }
 0x611   : > { %v1794_v22 = vpack.c.bf16 %v1776_v20, %v1775_v18  ;;  %v1958_v20 = vld [vmem:[#allocation5 + $0x7] ss:$8 sm:$0x3] }
 0x613   : > { %2938 = vmatprep.mubr.msk.bf16.mxu0 %vm980_vm0, %v1794_v22  ;;  %v4179_v22 = vrot.slane %v1958_v20, %v1458_v6 }
 0x614   : > { %2939 = vmatmul.mubr.msk.bf16.gmra.mrb[68].mxu0 %vm980_vm0, %v1795_v21  ;;  %v4175_v21 = vrot.slane %v1958_v20, %v1358_v9 }
 0x67e   : > { %v2928_v24 = vpop.f32.mrb[56].mxu0 }
 0x67f   : > { %v1887_v25 = vadd.f32 %v2928_v24, %v1779_v23  ;;  %v1878_v26 = vpop.f32.mrb[57].mxu0 }
 0x680   : > { %v1879_v28 = vadd.f32 %v1878_v26, %v1779_v23  ;;  %v2929_v29 = vpop.f32.mrb[58].mxu0 }
 0x681   : > { %v1890_v30 = vadd.f32 %v2929_v29, %v1779_v23  ;;  %v1881_v31 = vpop.f32.mrb[59].mxu0  ;;  %v1943_v14 = vmax.f32 %v1887_v25, 0.0 }
 0x682   : > { %v1882_v32 = vadd.f32 %v1881_v31, %v1779_v23  ;;  %v1941_v34 = vmax.f32 %v1879_v28, 0.0 }
 0x683   : > { %v1944_v33 = vmax.f32 %v1890_v30, 0.0 }
 0x684   : > { %v1942_v8 = vmax.f32 %v1882_v32, 0.0 }
 0x685   : > { %v1976_v35 = vpack.c.bf16 %v1944_v33, %v1943_v14 }
 0x686   : > { %v1975_v36 = vpack.c.bf16 %v1942_v8, %v1941_v34 }
 0x688   : > { %2107 = vmatmul.mubr.bf16.vlgmr.msra.gmra.mrb[40].mxu1 %v1975_v36 }
 0x689   : > { %2116 = vmatprep.mubr.bf16.mxu1 %v3473_v27 }
 0x690   : > { %2117 = vmatmul.mubr.bf16.gmra.mrb[44].mxu1 %v1976_v35 }
 0x691   : > { %2126 = vmatprep.mubr.bf16.mxu1 %v3473_v27 }
 0x69f   : > { %v2932_v37 = vpop.f32.mrb[60].mxu0 }
 0x6a0   : > { %v1903_v38 = vadd.f32 %v2932_v37, %v1779_v23  ;;  %v1894_v39 = vpop.f32.mrb[61].mxu0 }
 0x6a1   : > { %v1895_v41 = vadd.f32 %v1894_v39, %v1779_v23  ;;  %v2933_v42 = vpop.f32.mrb[62].mxu0 }
 0x6a2   : > { %v1906_v10 = vadd.f32 %v2933_v42, %v1779_v23  ;;  %v1897_v43 = vpop.f32.mrb[63].mxu0  ;;  %v1947_v45 = vmax.f32 %v1903_v38, 0.0 }
 0x6a3   : > { %v1898_v44 = vadd.f32 %v1897_v43, %v1779_v23  ;;  %v1945_v47 = vmax.f32 %v1895_v41, 0.0 }
 0x6a4   : > { %v1948_v46 = vmax.f32 %v1906_v10, 0.0 }
 0x6a5   : > { %v1946_v48 = vmax.f32 %v1898_v44, 0.0 }
 0x6a6   : > { %v1978_v49 = vpack.c.bf16 %v1948_v46, %v1947_v45 }
 0x6a7   : > { %v1977_v50 = vpack.c.bf16 %v1946_v48, %v1945_v47 }
 0x6a9   : > { %2127 = vmatmul.mubr.bf16.gmra.mrb[48].mxu1 %v1977_v50 }
 0x6aa   : > { %2136 = vmatprep.mubr.bf16.mxu1 %v3473_v27 }
 0x6b1   : > { %2137 = vmatmul.mubr.bf16.gmra.mrb[52].mxu1 %v1978_v49 }
 0x6b2   : > { %2146 = vmatprep.mubr.bf16.mxu1 %v3473_v27 }
 0x6c8   : > { %v2936_v51 = vpop.f32.mrb[64].mxu0 }
 0x6c9   : > { %v1919_v52 = vadd.f32 %v2936_v51, %v1779_v23  ;;  %v1910_v53 = vpop.f32.mrb[65].mxu0 }
 0x6ca   : > { %v1911_v54 = vadd.f32 %v1910_v53, %v1779_v23  ;;  %v2937_v55 = vpop.f32.mrb[66].mxu0 }
 0x6cb   : > { %v1922_v56 = vadd.f32 %v2937_v55, %v1779_v23  ;;  %v1913_v57 = vpop.f32.mrb[67].mxu0  ;;  %v1951_v59 = vmax.f32 %v1919_v52, 0.0 }
 0x6cc   : > { %v1914_v58 = vadd.f32 %v1913_v57, %v1779_v23  ;;  %v1949_v61 = vmax.f32 %v1911_v54, 0.0 }
 0x6cd   : > { %v1952_v60 = vmax.f32 %v1922_v56, 0.0 }
 0x6ce   : > { %v1950_v15 = vmax.f32 %v1914_v58, 0.0 }
 0x6cf   : > { %v1980_v62 = vpack.c.bf16 %v1952_v60, %v1951_v59 }
 0x6d0   : > { %v1979_v63 = vpack.c.bf16 %v1950_v15, %v1949_v61 }
 0x6d2   : > { %2147 = vmatmul.mubr.bf16.gmra.mrb[56].mxu1 %v1979_v63 }
 0x6d3   : > { %2156 = vmatprep.mubr.bf16.mxu1 %v3473_v27 }
 0x6da   : > { %2157 = vmatmul.mubr.bf16.gmra.mrb[60].mxu1 %v1980_v62 }
 0x6db   : > { %2166 = vmatprep.mubr.bf16.mxu1 %v3473_v27 }
 0x6e7   : > { %v2940_v0 = vpop.f32.mrb[68].mxu0 }
 0x6e8   : > { %v1935_v1 = vadd.f32 %v2940_v0, %v1779_v23  ;;  %v1926_v13 = vpop.f32.mrb[69].mxu0 }
 0x6e9   : > { %v1927_v2 = vadd.f32 %v1926_v13, %v1779_v23  ;;  %v2941_v4 = vpop.f32.mrb[70].mxu0 }
 0x6ea   : > { %v1938_v5 = vadd.f32 %v2941_v4, %v1779_v23  ;;  %v1929_v19 = vpop.f32.mrb[71].mxu0  ;;  %v1955_v11 = vmax.f32 %v1935_v1, 0.0 }
 0x6eb   : > { %v1930_v7 = vadd.f32 %v1929_v19, %v1779_v23  ;;  %v1953_v40 = vmax.f32 %v1927_v2, 0.0 }
 0x6ec   : > { %v1956_v12 = vmax.f32 %v1938_v5, 0.0 }
 0x6ed   : > { %v1954_v16 = vmax.f32 %v1930_v7, 0.0 }
 0x6ee   : > { %v1982_v17 = vpack.c.bf16 %v1956_v12, %v1955_v11 }
 0x6ef   : > { %v1981_v18 = vpack.c.bf16 %v1954_v16, %v1953_v40 }
 0x6f1   : > { %2167 = vmatmul.mubr.bf16.gmra.mrb[64].mxu1 %v1981_v18 }
 0x6f2   : > { %2176 = vmatprep.mubr.bf16.mxu1 %v3473_v27 }
 0x6f9   : > { %2177 = vmatmul.mubr.bf16.gmra.mrb[68].mxu1 %v1982_v17 }
 0x75b   : > { %v2108_v23 = vpop.f32.mrb[40].mxu1 }
 0x75c   : > { %v2109_v24 = vadd.f32 %v2108_v23, %v4175_v21  ;;  %v2110_v25 = vpop.f32.mrb[41].mxu1 }
 0x75d   : > { %v2111_v26 = vadd.f32 %v2110_v25, %v4179_v22  ;;  %v2112_v28 = vpop.f32.mrb[42].mxu1 }
 0x75e   : > { %v2662_v29 = vmul.f32 -1.442695, %v2109_v24  ;;  %v2113_v27 = vadd.f32 %v2112_v28, %v4175_v21  ;;  %v2114_v30 = vpop.f32.mrb[43].mxu1 }
 0x75f   : > { %v2663_v31 = vmul.f32 -1.442695, %v2111_v26  ;;  %v2115_v32 = vadd.f32 %v2114_v30, %v4179_v22 }
 0x760   : > { %3146 = vpow2.f32 %v2662_v29  ;;  %v2664_v9 = vmul.f32 -1.442695, %v2113_v27 }
 0x761   : > { %3148 = vpow2.f32 %v2663_v31  ;;  %v2665_v3 = vmul.f32 -1.442695, %v2115_v32 }
 0x762   : > { %3150 = vpow2.f32 %v2664_v9 }
 0x763   : > { %3152 = vpow2.f32 %v2665_v3  ;;  %v2118_v6 = vpop.f32.mrb[44].mxu1 }
 0x764   : > { %v2119_v14 = vadd.f32 %v2118_v6, %v4175_v21  ;;  %v2120_v33 = vpop.f32.mrb[45].mxu1 }
 0x765   : > { %v2121_v34 = vadd.f32 %v2120_v33, %v4179_v22  ;;  %v2122_v8 = vpop.f32.mrb[46].mxu1 }
 0x766   : > { %v2666_v35 = vmul.f32 -1.442695, %v2119_v14  ;;  %v2123_v36 = vadd.f32 %v2122_v8, %v4175_v21  ;;  %v2124_v37 = vpop.f32.mrb[47].mxu1 }
 0x767   : > { %v2667_v38 = vmul.f32 -1.442695, %v2121_v34  ;;  %v2125_v39 = vadd.f32 %v2124_v37, %v4179_v22 }
 0x768   : > { %3154 = vpow2.f32 %v2666_v35  ;;  %v2668_v41 = vmul.f32 -1.442695, %v2123_v36 }
 0x769   : > { %3156 = vpow2.f32 %v2667_v38  ;;  %v2669_v42 = vmul.f32 -1.442695, %v2125_v39 }
 0x76a   : > { %v3147_v10 = vpop.eup %3146  ;;  %3158 = vpow2.f32 %v2668_v41 }
 0x76b   : > { %v3149_v43 = vpop.eup %3148  ;;  %v2283_v44 = vadd.f32 1.0, %v3147_v10  ;;  %3160 = vpow2.f32 %v2669_v42 }
 0x76c   : > { %v3151_v45 = vpop.eup %3150  ;;  %v2284_v46 = vadd.f32 1.0, %v3149_v43 }
 0x76d   : > { %v3153_v47 = vpop.eup %3152  ;;  %3162 = vrcp.f32 %v2283_v44  ;;  %v2285_v48 = vadd.f32 1.0, %v3151_v45 }
 0x76e   : > { %3164 = vrcp.f32 %v2284_v46  ;;  %v2286_v49 = vadd.f32 1.0, %v3153_v47 }
 0x76f   : > { %3166 = vrcp.f32 %v2285_v48 }
 0x770   : > { %3168 = vrcp.f32 %v2286_v49 }
 0x772   : > { %v3155_v50 = vpop.eup %3154 }
 0x773   : > { %v3157_v51 = vpop.eup %3156  ;;  %v2287_v52 = vadd.f32 1.0, %v3155_v50 }
 0x774   : > { %v3159_v53 = vpop.eup %3158  ;;  %v2288_v54 = vadd.f32 1.0, %v3157_v51 }
 0x775   : > { %v3161_v55 = vpop.eup %3160  ;;  %3170 = vrcp.f32 %v2287_v52  ;;  %v2289_v56 = vadd.f32 1.0, %v3159_v53 }
 0x776   : > { %3172 = vrcp.f32 %v2288_v54  ;;  %v2290_v57 = vadd.f32 1.0, %v3161_v55 }
 0x777   : > { %v3163_v58 = vpop.eup %3162  ;;  %3174 = vrcp.f32 %v2289_v56 }
 0x778   : > { %v3165_v59 = vpop.eup %3164  ;;  %2379 = vst [vmem:[%s4191_s25] sm:$0xff] %v3163_v58  ;;  %3176 = vrcp.f32 %v2290_v57 }
 0x779   : > { %v3167_v60 = vpop.eup %3166  ;;  %2380 = vst [vmem:[%s4191_s25 + $0x8] sm:$0xff] %v3165_v59 }
 0x77a   : > { %v3169_v61 = vpop.eup %3168  ;;  %2381 = vst [vmem:[%s4191_s25 + $0x10] sm:$0xff] %v3167_v60 }
 0x77b   : > { %2382 = vst [vmem:[%s4191_s25 + $0x18] sm:$0xff] %v3169_v61 }
 0x77c   : > { %v2128_v15 = vpop.f32.mrb[48].mxu1 }
 0x77d   : > { %v2129_v62 = vadd.f32 %v2128_v15, %v4175_v21  ;;  %v2130_v63 = vpop.f32.mrb[49].mxu1 }
 0x77e   : > { %v2131_v0 = vadd.f32 %v2130_v63, %v4179_v22  ;;  %v2132_v1 = vpop.f32.mrb[50].mxu1 }
 0x77f   : > { %v3171_v13 = vpop.eup %3170  ;;  %v2670_v2 = vmul.f32 -1.442695, %v2129_v62  ;;  %v2133_v4 = vadd.f32 %v2132_v1, %v4175_v21  ;;  %v2134_v5 = vpop.f32.mrb[51].mxu1 }
 0x780   : > { %v3173_v19 = vpop.eup %3172  ;;  %2383 = vst [vmem:[%s4191_s25 + $0x20] sm:$0xff] %v3171_v13  ;;  %v2671_v7 = vmul.f32 -1.442695, %v2131_v0  ;;  %v2135_v11 = vadd.f32 %v2134_v5, %v4179_v22 }
 0x781   : > { %v3175_v12 = vpop.eup %3174  ;;  %2384 = vst [vmem:[%s4191_s25 + $0x28] sm:$0xff] %v3173_v19  ;;  %3178 = vpow2.f32 %v2670_v2  ;;  %v2672_v40 = vmul.f32 -1.442695, %v2133_v4 }
 0x782   : > { %v3177_v16 = vpop.eup %3176  ;;  %2385 = vst [vmem:[%s4191_s25 + $0x30] sm:$0xff] %v3175_v12  ;;  %3180 = vpow2.f32 %v2671_v7  ;;  %v2673_v17 = vmul.f32 -1.442695, %v2135_v11 }
 0x783   : > { %2386 = vst [vmem:[%s4191_s25 + $0x38] sm:$0xff] %v3177_v16  ;;  %3182 = vpow2.f32 %v2672_v40 }
 0x784   : > { %3184 = vpow2.f32 %v2673_v17  ;;  %v2138_v18 = vpop.f32.mrb[52].mxu1 }
 0x785   : > { %v2139_v20 = vadd.f32 %v2138_v18, %v4175_v21  ;;  %v2140_v23 = vpop.f32.mrb[53].mxu1 }
 0x786   : > { %v2141_v24 = vadd.f32 %v2140_v23, %v4179_v22  ;;  %v2142_v25 = vpop.f32.mrb[54].mxu1 }
 0x787   : > { %v2674_v26 = vmul.f32 -1.442695, %v2139_v20  ;;  %v2143_v28 = vadd.f32 %v2142_v25, %v4175_v21  ;;  %v2144_v29 = vpop.f32.mrb[55].mxu1 }
 0x788   : > { %v2675_v27 = vmul.f32 -1.442695, %v2141_v24  ;;  %v2145_v30 = vadd.f32 %v2144_v29, %v4179_v22 }
 0x789   : > { %3186 = vpow2.f32 %v2674_v26  ;;  %v2676_v31 = vmul.f32 -1.442695, %v2143_v28 }
 0x78a   : > { %3188 = vpow2.f32 %v2675_v27  ;;  %v2677_v32 = vmul.f32 -1.442695, %v2145_v30 }
 0x78b   : > { %v3179_v9 = vpop.eup %3178  ;;  %3190 = vpow2.f32 %v2676_v31 }
 0x78c   : > { %v3181_v3 = vpop.eup %3180  ;;  %v2291_v6 = vadd.f32 1.0, %v3179_v9  ;;  %3192 = vpow2.f32 %v2677_v32 }
 0x78d   : > { %v3183_v14 = vpop.eup %3182  ;;  %v2292_v33 = vadd.f32 1.0, %v3181_v3 }
 0x78e   : > { %v3185_v34 = vpop.eup %3184  ;;  %3194 = vrcp.f32 %v2291_v6  ;;  %v2293_v8 = vadd.f32 1.0, %v3183_v14 }
 0x78f   : > { %3196 = vrcp.f32 %v2292_v33  ;;  %v2294_v35 = vadd.f32 1.0, %v3185_v34 }
 0x790   : > { %3198 = vrcp.f32 %v2293_v8 }
 0x791   : > { %3200 = vrcp.f32 %v2294_v35 }
 0x793   : > { %v3187_v36 = vpop.eup %3186 }
 0x794   : > { %v3189_v37 = vpop.eup %3188  ;;  %v2295_v38 = vadd.f32 1.0, %v3187_v36 }
 0x795   : > { %v3191_v39 = vpop.eup %3190  ;;  %v2296_v41 = vadd.f32 1.0, %v3189_v37 }
 0x796   : > { %v3193_v42 = vpop.eup %3192  ;;  %3202 = vrcp.f32 %v2295_v38  ;;  %v2297_v10 = vadd.f32 1.0, %v3191_v39 }
 0x797   : > { %3204 = vrcp.f32 %v2296_v41  ;;  %v2298_v43 = vadd.f32 1.0, %v3193_v42 }
 0x798   : > { %v3195_v44 = vpop.eup %3194  ;;  %3206 = vrcp.f32 %v2297_v10 }
 0x799   : > { %v3197_v45 = vpop.eup %3196  ;;  %2387 = vst [vmem:[%s4191_s25 + $0x40] sm:$0xff] %v3195_v44  ;;  %3208 = vrcp.f32 %v2298_v43 }
 0x79a   : > { %v3199_v46 = vpop.eup %3198  ;;  %2388 = vst [vmem:[%s4191_s25 + $0x48] sm:$0xff] %v3197_v45 }
 0x79b   : > { %v3201_v47 = vpop.eup %3200  ;;  %2389 = vst [vmem:[%s4191_s25 + $0x50] sm:$0xff] %v3199_v46 }
 0x79c   : > { %2390 = vst [vmem:[%s4191_s25 + $0x58] sm:$0xff] %v3201_v47 }
 0x7a0   : > { %v3203_v48 = vpop.eup %3202 }
 0x7a1   : > { %v3205_v49 = vpop.eup %3204  ;;  %2391 = vst [vmem:[%s4191_s25 + $0x60] sm:$0xff] %v3203_v48 }
 0x7a2   : > { %v3207_v50 = vpop.eup %3206  ;;  %2392 = vst [vmem:[%s4191_s25 + $0x68] sm:$0xff] %v3205_v49 }
 0x7a3   : > { %v3209_v51 = vpop.eup %3208  ;;  %2393 = vst [vmem:[%s4191_s25 + $0x70] sm:$0xff] %v3207_v50 }
 0x7a4   : > { %2394 = vst [vmem:[%s4191_s25 + $0x78] sm:$0xff] %v3209_v51 }
 0x7a5   : > { %v2148_v52 = vpop.f32.mrb[56].mxu1 }
 0x7a6   : > { %v2149_v53 = vadd.f32 %v2148_v52, %v4175_v21  ;;  %v2150_v54 = vpop.f32.mrb[57].mxu1 }
 0x7a7   : > { %v2151_v55 = vadd.f32 %v2150_v54, %v4179_v22  ;;  %v2152_v56 = vpop.f32.mrb[58].mxu1 }
 0x7a8   : > { %v2678_v57 = vmul.f32 -1.442695, %v2149_v53  ;;  %v2153_v58 = vadd.f32 %v2152_v56, %v4175_v21  ;;  %v2154_v59 = vpop.f32.mrb[59].mxu1 }
 0x7a9   : > { %v2679_v60 = vmul.f32 -1.442695, %v2151_v55  ;;  %v2155_v61 = vadd.f32 %v2154_v59, %v4179_v22 }
 0x7aa   : > { %3210 = vpow2.f32 %v2678_v57  ;;  %v2680_v15 = vmul.f32 -1.442695, %v2153_v58 }
 0x7ab   : > { %3212 = vpow2.f32 %v2679_v60  ;;  %v2681_v62 = vmul.f32 -1.442695, %v2155_v61 }
 0x7ac   : > { %3214 = vpow2.f32 %v2680_v15 }
 0x7ad   : > { %3216 = vpow2.f32 %v2681_v62  ;;  %v2158_v63 = vpop.f32.mrb[60].mxu1 }
 0x7ae   : > { %v2159_v0 = vadd.f32 %v2158_v63, %v4175_v21  ;;  %v2160_v1 = vpop.f32.mrb[61].mxu1 }
 0x7af   : > { %v2161_v13 = vadd.f32 %v2160_v1, %v4179_v22  ;;  %v2162_v2 = vpop.f32.mrb[62].mxu1 }
 0x7b0   : > { %v2682_v4 = vmul.f32 -1.442695, %v2159_v0  ;;  %v2163_v5 = vadd.f32 %v2162_v2, %v4175_v21  ;;  %v2164_v19 = vpop.f32.mrb[63].mxu1 }
 0x7b1   : > { %v2683_v7 = vmul.f32 -1.442695, %v2161_v13  ;;  %v2165_v11 = vadd.f32 %v2164_v19, %v4179_v22 }
 0x7b2   : > { %3218 = vpow2.f32 %v2682_v4  ;;  %v2684_v12 = vmul.f32 -1.442695, %v2163_v5 }
 0x7b3   : > { %3220 = vpow2.f32 %v2683_v7  ;;  %v2685_v40 = vmul.f32 -1.442695, %v2165_v11 }
 0x7b4   : > { %v3211_v16 = vpop.eup %3210  ;;  %3222 = vpow2.f32 %v2684_v12 }
 0x7b5   : > { %v3213_v17 = vpop.eup %3212  ;;  %v2299_v18 = vadd.f32 1.0, %v3211_v16  ;;  %3224 = vpow2.f32 %v2685_v40 }
 0x7b6   : > { %v3215_v20 = vpop.eup %3214  ;;  %v2300_v23 = vadd.f32 1.0, %v3213_v17 }
 0x7b7   : > { %v3217_v24 = vpop.eup %3216  ;;  %3226 = vrcp.f32 %v2299_v18  ;;  %v2301_v25 = vadd.f32 1.0, %v3215_v20 }
 0x7b8   : > { %3228 = vrcp.f32 %v2300_v23  ;;  %v2302_v26 = vadd.f32 1.0, %v3217_v24 }
 0x7b9   : > { %3230 = vrcp.f32 %v2301_v25 }
 0x7ba   : > { %3232 = vrcp.f32 %v2302_v26 }
 0x7bc   : > { %v3219_v28 = vpop.eup %3218 }
 0x7bd   : > { %v3221_v29 = vpop.eup %3220  ;;  %v2303_v27 = vadd.f32 1.0, %v3219_v28 }
 0x7be   : > { %v3223_v30 = vpop.eup %3222  ;;  %v2304_v31 = vadd.f32 1.0, %v3221_v29 }
 0x7bf   : > { %v3225_v32 = vpop.eup %3224  ;;  %3234 = vrcp.f32 %v2303_v27  ;;  %v2305_v9 = vadd.f32 1.0, %v3223_v30 }
 0x7c0   : > { %3236 = vrcp.f32 %v2304_v31  ;;  %v2306_v3 = vadd.f32 1.0, %v3225_v32 }
 0x7c1   : > { %v3227_v6 = vpop.eup %3226  ;;  %3238 = vrcp.f32 %v2305_v9 }
 0x7c2   : > { %v3229_v14 = vpop.eup %3228  ;;  %2395 = vst [vmem:[%s4191_s25 + $0x80] sm:$0xff] %v3227_v6  ;;  %3240 = vrcp.f32 %v2306_v3 }
 0x7c3   : > { %v3231_v33 = vpop.eup %3230  ;;  %2396 = vst [vmem:[%s4191_s25 + $0x88] sm:$0xff] %v3229_v14 }
 0x7c4   : > { %v3233_v34 = vpop.eup %3232  ;;  %2397 = vst [vmem:[%s4191_s25 + $0x90] sm:$0xff] %v3231_v33  ;;  %v2168_v8 = vpop.f32.mrb[64].mxu1 }
 0x7c5   : > { %2398 = vst [vmem:[%s4191_s25 + $0x98] sm:$0xff] %v3233_v34  ;;  %v2169_v35 = vadd.f32 %v2168_v8, %v4175_v21  ;;  %v2170_v36 = vpop.f32.mrb[65].mxu1 }
 0x7c6   : > { %v2171_v37 = vadd.f32 %v2170_v36, %v4179_v22  ;;  %v2172_v38 = vpop.f32.mrb[66].mxu1 }
 0x7c7   : > { %v2686_v39 = vmul.f32 -1.442695, %v2169_v35  ;;  %v2173_v41 = vadd.f32 %v2172_v38, %v4175_v21  ;;  %v2174_v42 = vpop.f32.mrb[67].mxu1 }
 0x7c8   : > { %v2687_v10 = vmul.f32 -1.442695, %v2171_v37  ;;  %v2175_v43 = vadd.f32 %v2174_v42, %v4179_v22 }
 0x7c9   : > { %v3235_v44 = vpop.eup %3234  ;;  %3242 = vpow2.f32 %v2686_v39  ;;  %v2688_v45 = vmul.f32 -1.442695, %v2173_v41 }
 0x7ca   : > { %v3237_v46 = vpop.eup %3236  ;;  %2399 = vst [vmem:[%s4191_s25 + $0xa0] sm:$0xff] %v3235_v44  ;;  %3244 = vpow2.f32 %v2687_v10  ;;  %v2689_v47 = vmul.f32 -1.442695, %v2175_v43 }
 0x7cb   : > { %v3239_v48 = vpop.eup %3238  ;;  %2400 = vst [vmem:[%s4191_s25 + $0xa8] sm:$0xff] %v3237_v46  ;;  %3246 = vpow2.f32 %v2688_v45 }
 0x7cc   : > { %v3241_v49 = vpop.eup %3240  ;;  %2401 = vst [vmem:[%s4191_s25 + $0xb0] sm:$0xff] %v3239_v48  ;;  %3248 = vpow2.f32 %v2689_v47  ;;  %v2178_v50 = vpop.f32.mrb[68].mxu1 }
 0x7cd   : > { %2402 = vst [vmem:[%s4191_s25 + $0xb8] sm:$0xff] %v3241_v49  ;;  %v2179_v51 = vadd.f32 %v2178_v50, %v4175_v21  ;;  %v2180_v52 = vpop.f32.mrb[69].mxu1 }
 0x7ce   : > { %v2181_v53 = vadd.f32 %v2180_v52, %v4179_v22  ;;  %v2182_v54 = vpop.f32.mrb[70].mxu1 }
 0x7cf   : > { %v2690_v55 = vmul.f32 -1.442695, %v2179_v51  ;;  %v2183_v56 = vadd.f32 %v2182_v54, %v4175_v21  ;;  %v2184_v57 = vpop.f32.mrb[71].mxu1 }
 0x7d0   : > { %v2691_v58 = vmul.f32 -1.442695, %v2181_v53  ;;  %v2185_v59 = vadd.f32 %v2184_v57, %v4179_v22 }
 0x7d1   : > { %3250 = vpow2.f32 %v2690_v55  ;;  %v2692_v60 = vmul.f32 -1.442695, %v2183_v56 }
 0x7d2   : > { %3252 = vpow2.f32 %v2691_v58  ;;  %v2693_v61 = vmul.f32 -1.442695, %v2185_v59 }
 0x7d3   : > { %v3243_v15 = vpop.eup %3242  ;;  %3254 = vpow2.f32 %v2692_v60 }
 0x7d4   : > { %v3245_v62 = vpop.eup %3244  ;;  %v2307_v63 = vadd.f32 1.0, %v3243_v15  ;;  %3256 = vpow2.f32 %v2693_v61 }
 0x7d5   : > { %v3247_v0 = vpop.eup %3246  ;;  %v2308_v1 = vadd.f32 1.0, %v3245_v62 }
 0x7d6   : > { %v3249_v13 = vpop.eup %3248  ;;  %3258 = vrcp.f32 %v2307_v63  ;;  %v2309_v2 = vadd.f32 1.0, %v3247_v0 }
 0x7d7   : > { %3260 = vrcp.f32 %v2308_v1  ;;  %v2310_v21 = vadd.f32 1.0, %v3249_v13 }
 0x7d8   : > { %3262 = vrcp.f32 %v2309_v2 }
 0x7d9   : > { %3264 = vrcp.f32 %v2310_v21 }
 0x7db   : > { %v3251_v22 = vpop.eup %3250 }
 0x7dc   : > { %v3253_v4 = vpop.eup %3252  ;;  %v2311_v5 = vadd.f32 1.0, %v3251_v22 }
 0x7dd   : > { %v3255_v19 = vpop.eup %3254  ;;  %v2312_v7 = vadd.f32 1.0, %v3253_v4 }
 0x7de   : > { %v3257_v11 = vpop.eup %3256  ;;  %3266 = vrcp.f32 %v2311_v5  ;;  %v2313_v12 = vadd.f32 1.0, %v3255_v19 }
 0x7df   : > { %3268 = vrcp.f32 %v2312_v7  ;;  %v2314_v40 = vadd.f32 1.0, %v3257_v11 }
 0x7e0   : > { %v3259_v16 = vpop.eup %3258  ;;  %3270 = vrcp.f32 %v2313_v12 }
 0x7e1   : > { %v3261_v17 = vpop.eup %3260  ;;  %2403 = vst [vmem:[%s4191_s25 + $0xc0] sm:$0xff] %v3259_v16  ;;  %3272 = vrcp.f32 %v2314_v40 }
 0x7e2   : > { %v3263_v18 = vpop.eup %3262  ;;  %2404 = vst [vmem:[%s4191_s25 + $0xc8] sm:$0xff] %v3261_v17 }
 0x7e3   : > { %v3265_v20 = vpop.eup %3264  ;;  %2405 = vst [vmem:[%s4191_s25 + $0xd0] sm:$0xff] %v3263_v18 }
 0x7e4   : > { %2406 = vst [vmem:[%s4191_s25 + $0xd8] sm:$0xff] %v3265_v20 }
 0x7e8   : > { %v3267_v23 = vpop.eup %3266 }
 0x7e9   : > { %v3269_v24 = vpop.eup %3268  ;;  %2407 = vst [vmem:[%s4191_s25 + $0xe0] sm:$0xff] %v3267_v23 }
 0x7ea   : > { %v3271_v25 = vpop.eup %3270  ;;  %2408 = vst [vmem:[%s4191_s25 + $0xe8] sm:$0xff] %v3269_v24 }
 0x7eb   : > { %v3273_v26 = vpop.eup %3272  ;;  %2409 = vst [vmem:[%s4191_s25 + $0xf0] sm:$0xff] %v3271_v25 }
 0x7ec   : > { %2410 = vst [vmem:[%s4191_s25 + $0xf8] sm:$0xff] %v3273_v26 }
 0x7ed   : > { %3401 = shalt.err (!%p3398_p0)
}
 0x7ee   : > { %s3402_s12 = scalar_lea.hbm %s4251_s22, 4096  ;;  %s3406_s10 = scalar_lea.hbm %s4335_s23, 8192 }
 0x7ef   : > { %p3403_p5 = scmp.ne.s32.totalorder %s4251_s22, %s3402_s12  ;;  %p3407_p12 = scmp.lt.u32.totalorder %s4251_s22, %s4335_s23 }
 0x7f0   : > { %p3408_p2 = scmp.lt.u32.totalorder %s3406_s10, %s3402_s12  ;;  %p3410_p4 = scmp.lt.u32.totalorder %s3402_s12, %s4251_s22 }
 0x7f1   : > { %p3404_p11 = pnand %p3403_p5, %p3680_p6 }
 0x7f2   : > { %p3409_p1 = por %p3408_p2, %p3407_p12 }
 0x7f3   : > { %p3405_p9 = pneg %p3404_p11 }
 0x7f4   : > { %p3411_p8 = por %p3410_p4, %p3409_p1 }
 0x7f6   : > { %p3412_p3 = pnand %p3411_p8, %p3405_p9 }
 0x7f8   : > { %3415 = shalt.err (!%p3412_p3)
}
 0x7f9   : > { %s3476_s29 = smov 256   ;;  %s3477_s14 = smov 16  }
 0x7fa   : > { %2972 = dma.vmem_to_hbm [thread:$0]  (%p3680_p6), %s4253_s27, 4096, %s4251_s22, %s2412_s21, %s3476_s29, %s3476_s29, %s3477_s14  }
 0x7fb PF: > { %s4336_s13 = sld [smem:[#allocation15_spill]]  ;;  %s4337_s25 = sld [smem:[#allocation16_spill]] }
 0x7fc   : > { %p4339_p10 = scmp.ge.s32.totalorder %s3462_s20, 2 }
 0x801   : > { %s2450_s30 = sand.u32 1, %s4336_s13   ;;  %p4338_p7 = scmp.ne.s32.totalorder %s4337_s25, 0 }
 0x802   : > { %s2451_s12 = scalar_lea.sflag [#allocation4], %s2450_s30 }
 0x803   : > { %p2989_p13 = pnand %p4339_p10, %p4338_p7 }
 0x805   : > { %3445 = dma.done.wait (!%p2989_p13), %s2451_s12, 4096  }
 0x806   : > { %3447 = vsyncadd (!%p2989_p13), %s2451_s12, 4294963200  ;;  %p27_p0 = scmp.ge.s32.totalorder %s3666_s15, 4   ;;  %s4340_s17 = smov %s3454_s18 }
 0x807   : > { %s4341_s18 = smov %s3458_s19  ;;  %s4342_s19 = smov %s3676_s16 }
 0x808   : > { %s4343_s20 = smov %s3666_s15  ;;  %29 = sbr.rel (!%p27_p0) target bundleno = 9 (0x9), region = 130 }
 0x80f   :  { %2464 = vsyncpa [#allocation3], 1 }
 0x810   :  { %2466 = vsyncpa [#allocation3 + $0x1], 1 }
 0x811   :  { %2467 = vsyncpa [#allocation6], 1 }
 0x812   :  { %2468 = vsyncpa [#allocation9], 1 }
 0x813   :  { %2469 = vsyncpa [#allocation4], 1 }
 0x814   :  { %2471 = vsyncpa [#allocation4 + $0x1], 1 }

</bundles_post_ra>
